<compile_context>
chip_gen: v7x
topology: tpu7x:2x2x1
jax: 0.10.0
libtpu: 0.0.40
codegen_flags: <defaults>
</compile_context>

<pallas_src>
import numpy as np
import jax
import jax.numpy as jnp
from jax.experimental import pallas as pl
from jax.experimental.pallas import tpu as pltpu


# ----------------------------------------------------------------------------
# Spatial operator factors (host-side glue, plain numpy)
# ----------------------------------------------------------------------------
def avg_pool_matrix(n, k):
    """(n//k, n) matrix implementing average pooling with kernel=stride=k."""
    m = n // k
    P = np.zeros((m, n), np.float32)
    for i in range(m):
        P[i, i * k:(i + 1) * k] = 1.0 / k
    return P


def bilinear_up_matrix(n_out, n_in):
    """(n_out, n_in) bilinear interpolation matrix, align_corners=True."""
    U = np.zeros((n_out, n_in), np.float32)
    if n_in == 1:
        U[:, 0] = 1.0
        return U
    for i in range(n_out):
        src = i * (n_in - 1) / (n_out - 1) if n_out > 1 else 0.0
        i0 = min(int(np.floor(src)), n_in - 2)
        frac = src - i0
        U[i, i0] += 1.0 - frac
        U[i, i0 + 1] += frac
    return U


def spatial_factors(H, W, level):
    """Factored low-rank pool / upsample operators for one pyramid level.

    Returns (P^T, U^T) with P^T:(HW, hw_s) and U^T:(hw_s, HW) so that, in the
    transposed (channels, HW) layout, pool+upsample is  (feat @ P^T) @ U^T.
    Both P and U are row-stochastic, so per-channel biases pass through.
    """
    Ph = avg_pool_matrix(H, level)           # (H//level, H)
    Pw = avg_pool_matrix(W, level)           # (W//level, W)
    Uh = bilinear_up_matrix(H, H // level)   # (H, H//level)
    Uw = bilinear_up_matrix(W, W // level)   # (W, W//level)
    P = np.kron(Ph, Pw)                      # (hw_s, HW)
    U = np.kron(Uh, Uw)                      # (HW, hw_s)
    return jnp.asarray(P.T), jnp.asarray(U.T)


# ----------------------------------------------------------------------------
# Offline parameter folding (channel algebra + BatchNorm, all linear)
# ----------------------------------------------------------------------------
def fold_params(params):
    """Fold 1x1 convs, fusion groups, biases and inference BN into 2 matrices.

      fused = A @ [feat; up2; up4] + bias         (per-pixel)
    with feat = w1 @ x (bias folded through the row-stochastic spatial ops).
    """
    C = params["wf"].shape[0]
    Cq = params["w1"].shape[0]
    wf = params["wf"]                                     # (C, 4*Cq), PyTorch [out, in]
    wf0, wf1, wf2, wf3 = (wf[:, g * Cq:(g + 1) * Cq] for g in range(4))

    a0 = wf0 + wf1 @ params["wp1"]          # level-1 branch folded (identity spatially)
    a2 = wf2 @ params["wp2"]                # level-2 pyramid conv folded into fusion
    a4 = wf3 @ params["wp4"]                # level-4 pyramid conv folded into fusion

    b_total = (params["bf"]
               + wf1 @ params["bp1"] + wf2 @ params["bp2"] + wf3 @ params["bp4"]
               + (a0 + a2 + a4) @ params["b1"])           # conv_1x1 bias folded through

    s = params["bn_scale"]                                # inference-mode BN fold
    A = jnp.concatenate([a0, a2, a4], axis=1) * s[:, None]   # (C, 3*Cq)
    return {
        "w1": params["w1"],                               # (Cq, C)
        "A": A,                                           # (C, 3*Cq)
        "bias": (s * b_total + params["bn_shift"]).reshape(C, 1),
    }


# ----------------------------------------------------------------------------
# Pallas kernel: one batch element per grid step, lane-dense (C, HW) layout.
# ----------------------------------------------------------------------------
def fpa_kernel(x_ref, w1_ref, p2t_ref, u2t_ref, p4t_ref, u4t_ref,
               a_ref, b_ref, out_ref):
    f32 = jnp.float32
    x = x_ref[...]                                                    # (C, HW)

    # conv_1x1 (bias folded into the final bias): C -> C//4
    feat = jnp.dot(w1_ref[...], x, preferred_element_type=f32)       # (Cq, HW)

    # pyramid level 2 / 4: pool then upsample via low-rank factored operators
    up2 = jnp.dot(jnp.dot(feat, p2t_ref[...], preferred_element_type=f32),
                  u2t_ref[...], preferred_element_type=f32)          # (Cq, HW)
    up4 = jnp.dot(jnp.dot(feat, p4t_ref[...], preferred_element_type=f32),
                  u4t_ref[...], preferred_element_type=f32)          # (Cq, HW)

    # fusion 1x1 conv + BN, all folded offline into a single (C, 3*Cq) dot + bias
    stacked = jnp.concatenate([feat, up2, up4], axis=0)              # (3*Cq, HW)
    fused = jnp.dot(a_ref[...], stacked, preferred_element_type=f32) + b_ref[...]

    # ReLU + residual
    out_ref[...] = jnp.maximum(fused, 0.0) + x


def fpa_forward(x_nchw, folded, spatial, *, vmem_limit_bytes=32 * 1024 * 1024):
    N, C, H, W = x_nchw.shape
    Cq = folded["w1"].shape[0]
    HW = H * W
    p2t, u2t, p4t, u4t = spatial
    hw2, hw4 = p2t.shape[1], p4t.shape[1]
    x3 = x_nchw.reshape(N, C, HW)

    flops = N * 2 * Cq * HW * (4 * C + 2 * (hw2 + hw4))
    bytes_accessed = 4 * (2 * N * C * HW + 2 * HW * (hw2 + hw4)
                          + Cq * C + 3 * C * Cq + C)
    cost = pl.CostEstimate(flops=flops, transcendentals=0,
                           bytes_accessed=bytes_accessed)

    def const_spec(shape, single_buffer):
        imap = (lambda b, _n=len(shape): (0,) * _n)
        if single_buffer:
            # Constant index_map -> second pipeline buffer is pure waste.
            return pl.BlockSpec(shape, imap, pipeline_mode=pl.Buffered(1))
        return pl.BlockSpec(shape, imap)

    def build(single_buffer):
        grid_spec = pltpu.PrefetchScalarGridSpec(
            num_scalar_prefetch=0,
            grid=(N,),
            in_specs=[
                pl.BlockSpec((None, C, HW), lambda b: (b, 0, 0)),   # x, one image
                const_spec((Cq, C), single_buffer),                 # conv_1x1 weight
                const_spec((HW, hw2), single_buffer),               # P2^T
                const_spec((hw2, HW), single_buffer),               # U2^T
                const_spec((HW, hw4), single_buffer),               # P4^T
                const_spec((hw4, HW), single_buffer),               # U4^T
                const_spec((C, 3 * Cq), single_buffer),             # folded fusion A
                const_spec((C, 1), single_buffer),                  # folded bias
            ],
            out_specs=pl.BlockSpec((None, C, HW), lambda b: (b, 0, 0)),
        )
        return pl.pallas_call(
            fpa_kernel,
            out_shape=jax.ShapeDtypeStruct((N, C, HW), jnp.float32),
            grid_spec=grid_spec,
            compiler_params=pltpu.CompilerParams(
                dimension_semantics=("parallel",),
                vmem_limit_bytes=vmem_limit_bytes),
            cost_estimate=cost,
        )

    args = (x3, folded["w1"], p2t, u2t, p4t, u4t, folded["A"], folded["bias"])
    try:
        out = jax.block_until_ready(build(True)(*args))
    except Exception:
        # Fallback if single-buffered pipeline_mode is unsupported on this jax build.
        out = build(False)(*args)
    return out.reshape(N, C, H, W)


# ----------------------------------------------------------------------------
# Pure-JAX reference mirroring the PyTorch forward (NCHW, un-folded path)
# ----------------------------------------------------------------------------
def ref_forward(x, params, H, W):
    N, C, _, _ = x.shape
    Cq = C // 4
    feat = jnp.einsum("dc,nchw->ndhw", params["w1"], x) + params["b1"][None, :, None, None]
    pyr = [feat]
    convs = [(params["wp1"], params["bp1"]),
             (params["wp2"], params["bp2"]),
             (params["wp4"], params["bp4"])]
    for level, (wp, bp) in zip((1, 2, 4), convs):
        pooled = feat.reshape(N, Cq, H // level, level, W // level, level).mean(axis=(3, 5))
        proc = jnp.einsum("dc,nchw->ndhw", wp, pooled) + bp[None, :, None, None]
        Uh = jnp.asarray(bilinear_up_matrix(H, H // level))
        Uw = jnp.asarray(bilinear_up_matrix(W, W // level))
        up = jnp.einsum("ha,wb,ncab->nchw", Uh, Uw, proc)
        pyr.append(up)
    cat = jnp.concatenate(pyr, axis=1)
    fused = jnp.einsum("dc,nchw->ndhw", params["wf"], cat) + params["bf"][None, :, None, None]
    y = fused * params["bn_scale"][None, :, None, None] + params["bn_shift"][None, :, None, None]
    y = jnp.maximum(y, 0.0)
    return y + x


# ----------------------------------------------------------------------------
if __name__ == "__main__":
    # FPA(64) block of UNetResNet applied at the x1 feature map (input/4 resolution).
    N, C, H, W = 2, 64, 16, 16
    Cq = C // 4
    eps = 1e-5

    key = jax.random.PRNGKey(0)
    keys = jax.random.split(key, 16)

    x = jax.random.normal(keys[0], (N, C, H, W), jnp.float32)

    # Inference-mode BatchNorm folded into per-channel scale/shift.
    gamma = 1.0 + 0.1 * jax.random.normal(keys[11], (C,), jnp.float32)
    beta = 0.1 * jax.random.normal(keys[12], (C,), jnp.float32)
    running_mean = 0.1 * jax.random.normal(keys[13], (C,), jnp.float32)
    running_var = 1.0 + 0.1 * jax.nn.softplus(jax.random.normal(keys[14], (C,), jnp.float32))
    bn_scale = gamma / jnp.sqrt(running_var + eps)
    bn_shift = beta - running_mean * bn_scale

    # Synthetic parameters in PyTorch [out, in] convention.
    params = {
        "w1": (1.0 / np.sqrt(C)) * jax.random.normal(keys[1], (Cq, C), jnp.float32),
        "b1": 0.1 * jax.random.normal(keys[2], (Cq,), jnp.float32),
        "wp1": (1.0 / np.sqrt(Cq)) * jax.random.normal(keys[3], (Cq, Cq), jnp.float32),
        "bp1": 0.1 * jax.random.normal(keys[4], (Cq,), jnp.float32),
        "wp2": (1.0 / np.sqrt(Cq)) * jax.random.normal(keys[5], (Cq, Cq), jnp.float32),
        "bp2": 0.1 * jax.random.normal(keys[6], (Cq,), jnp.float32),
        "wp4": (1.0 / np.sqrt(Cq)) * jax.random.normal(keys[7], (Cq, Cq), jnp.float32),
        "bp4": 0.1 * jax.random.normal(keys[8], (Cq,), jnp.float32),
        "wf": (1.0 / np.sqrt(C)) * jax.random.normal(keys[9], (C, C), jnp.float32),
        "bf": 0.1 * jax.random.normal(keys[10], (C,), jnp.float32),
        "bn_scale": bn_scale,
        "bn_shift": bn_shift,
    }

    folded = fold_params(params)
    p2t, u2t = spatial_factors(H, W, 2)
    p4t, u4t = spatial_factors(H, W, 4)

    out = fpa_forward(x, folded, (p2t, u2t, p4t, u4t))
    out = jax.block_until_ready(out)

    ref = jax.block_until_ready(ref_forward(x, params, H, W))
    np.testing.assert_allclose(np.asarray(out), np.asarray(ref), rtol=5e-3, atol=5e-3)

    print("KERNEL_OK")
</pallas_src>

<mosaic_0001>
module attributes {stable_mosaic.version = 11 : i64} {
  func.func @fpa_kernel(%arg0: i32, %arg1: memref<1x64x256xf32, #tpu.memory_space<vmem>>, %arg2: memref<16x64xf32, #tpu.memory_space<vmem>>, %arg3: memref<256x64xf32, #tpu.memory_space<vmem>>, %arg4: memref<64x256xf32, #tpu.memory_space<vmem>>, %arg5: memref<256x16xf32, #tpu.memory_space<vmem>>, %arg6: memref<16x256xf32, #tpu.memory_space<vmem>>, %arg7: memref<64x48xf32, #tpu.memory_space<vmem>>, %arg8: memref<64x1xf32, #tpu.memory_space<vmem>>, %arg9: memref<1x64x256xf32, #tpu.memory_space<vmem>>) attributes {dimension_semantics = [#tpu.dimension_semantics<parallel>], iteration_bounds = array<i64: 2>, scalar_prefetch = 0 : i64, scratch_operands = 0 : i64, tpu.core_type = #tpu.core_type<tc>, window_params = [{transform_indices = @transform_0, window_bounds = array<i64: 1, 64, 256>}, {pipeline_mode = #tpu.pipeline_mode<synchronous>, transform_indices = @transform_1, window_bounds = array<i64: 16, 64>}, {pipeline_mode = #tpu.pipeline_mode<synchronous>, transform_indices = @transform_2, window_bounds = array<i64: 256, 64>}, {pipeline_mode = #tpu.pipeline_mode<synchronous>, transform_indices = @transform_3, window_bounds = array<i64: 64, 256>}, {pipeline_mode = #tpu.pipeline_mode<synchronous>, transform_indices = @transform_4, window_bounds = array<i64: 256, 16>}, {pipeline_mode = #tpu.pipeline_mode<synchronous>, transform_indices = @transform_5, window_bounds = array<i64: 16, 256>}, {pipeline_mode = #tpu.pipeline_mode<synchronous>, transform_indices = @transform_6, window_bounds = array<i64: 64, 48>}, {pipeline_mode = #tpu.pipeline_mode<synchronous>, transform_indices = @transform_7, window_bounds = array<i64: 64, 1>}, {transform_indices = @transform_8, window_bounds = array<i64: 1, 64, 256>}]} {
    %c0 = arith.constant 0 : index
    %c0_0 = arith.constant 0 : index
    %c0_1 = arith.constant 0 : index
    %0 = vector.load %arg1[%c0, %c0_0, %c0_1] : memref<1x64x256xf32, #tpu.memory_space<vmem>>, vector<1x64x256xf32>
    %1 = vector.shape_cast %0 : vector<1x64x256xf32> to vector<64x256xf32>
    %c0_2 = arith.constant 0 : index
    %c0_3 = arith.constant 0 : index
    %2 = vector.load %arg2[%c0_2, %c0_3] : memref<16x64xf32, #tpu.memory_space<vmem>>, vector<16x64xf32>
    %cst = arith.constant dense<0.000000e+00> : vector<16x256xf32>
    %3 = tpu.matmul %2, %1, %cst {dimension_numbers = #tpu.dot_dimension_numbers<[1], [0], [0], [1], [0, 0, 1, 1], [], []>} : vector<16x64xf32>, vector<64x256xf32>, vector<16x256xf32> -> vector<16x256xf32>
    %c0_4 = arith.constant 0 : index
    %c0_5 = arith.constant 0 : index
    %4 = vector.load %arg3[%c0_4, %c0_5] : memref<256x64xf32, #tpu.memory_space<vmem>>, vector<256x64xf32>
    %cst_6 = arith.constant dense<0.000000e+00> : vector<16x64xf32>
    %5 = tpu.matmul %3, %4, %cst_6 {dimension_numbers = #tpu.dot_dimension_numbers<[1], [0], [0], [1], [0, 0, 1, 1], [], []>} : vector<16x256xf32>, vector<256x64xf32>, vector<16x64xf32> -> vector<16x64xf32>
    %c0_7 = arith.constant 0 : index
    %c0_8 = arith.constant 0 : index
    %6 = vector.load %arg4[%c0_7, %c0_8] : memref<64x256xf32, #tpu.memory_space<vmem>>, vector<64x256xf32>
    %cst_9 = arith.constant dense<0.000000e+00> : vector<16x256xf32>
    %7 = tpu.matmul %5, %6, %cst_9 {dimension_numbers = #tpu.dot_dimension_numbers<[1], [0], [0], [1], [0, 0, 1, 1], [], []>} : vector<16x64xf32>, vector<64x256xf32>, vector<16x256xf32> -> vector<16x256xf32>
    %c0_10 = arith.constant 0 : index
    %c0_11 = arith.constant 0 : index
    %8 = vector.load %arg5[%c0_10, %c0_11] : memref<256x16xf32, #tpu.memory_space<vmem>>, vector<256x16xf32>
    %cst_12 = arith.constant dense<0.000000e+00> : vector<16x16xf32>
    %9 = tpu.matmul %3, %8, %cst_12 {dimension_numbers = #tpu.dot_dimension_numbers<[1], [0], [0], [1], [0, 0, 1, 1], [], []>} : vector<16x256xf32>, vector<256x16xf32>, vector<16x16xf32> -> vector<16x16xf32>
    %c0_13 = arith.constant 0 : index
    %c0_14 = arith.constant 0 : index
    %10 = vector.load %arg6[%c0_13, %c0_14] : memref<16x256xf32, #tpu.memory_space<vmem>>, vector<16x256xf32>
    %cst_15 = arith.constant dense<0.000000e+00> : vector<16x256xf32>
    %11 = tpu.matmul %9, %10, %cst_15 {dimension_numbers = #tpu.dot_dimension_numbers<[1], [0], [0], [1], [0, 0, 1, 1], [], []>} : vector<16x16xf32>, vector<16x256xf32>, vector<16x256xf32> -> vector<16x256xf32>
    %12 = tpu.concatenate %3, %7, %11 in 0 : vector<16x256xf32>, vector<16x256xf32>, vector<16x256xf32> -> vector<48x256xf32>
    %c0_16 = arith.constant 0 : index
    %c0_17 = arith.constant 0 : index
    %13 = vector.load %arg7[%c0_16, %c0_17] : memref<64x48xf32, #tpu.memory_space<vmem>>, vector<64x48xf32>
    %cst_18 = arith.constant dense<0.000000e+00> : vector<64x256xf32>
    %14 = tpu.matmul %13, %12, %cst_18 {dimension_numbers = #tpu.dot_dimension_numbers<[1], [0], [0], [1], [0, 0, 1, 1], [], []>} : vector<64x48xf32>, vector<48x256xf32>, vector<64x256xf32> -> vector<64x256xf32>
    %c0_19 = arith.constant 0 : index
    %c0_20 = arith.constant 0 : index
    %15 = vector.load %arg8[%c0_19, %c0_20] : memref<64x1xf32, #tpu.memory_space<vmem>>, vector<64x1xf32>
    %16 = vector.broadcast %15 : vector<64x1xf32> to vector<64x256xf32>
    %17 = arith.addf %14, %16 : vector<64x256xf32>
    %cst_21 = arith.constant 0.000000e+00 : f32
    %18 = vector.broadcast %cst_21 : f32 to vector<64x256xf32>
    %19 = arith.maximumf %17, %18 : vector<64x256xf32>
    %20 = arith.addf %19, %1 : vector<64x256xf32>
    %c0_22 = arith.constant 0 : index
    %c0_23 = arith.constant 0 : index
    %c0_24 = arith.constant 0 : index
    %21 = vector.load %arg9[%c0_22, %c0_23, %c0_24] : memref<1x64x256xf32, #tpu.memory_space<vmem>>, vector<1x64x256xf32>
    %22 = vector.shape_cast %21 : vector<1x64x256xf32> to vector<64x256xf32>
    %23 = vector.shape_cast %20 : vector<64x256xf32> to vector<1x64x256xf32>
    tpu.vector_store %arg9[%c0_22, %c0_23, %c0_24], %23 {strides = array<i32>} : memref<1x64x256xf32, #tpu.memory_space<vmem>>, vector<1x64x256xf32>,
    return
  }
  func.func @transform_0(%arg0: i32) -> (i32, i32, i32) {
    %c0_i32 = arith.constant 0 : i32
    %c0_i32_0 = arith.constant 0 : i32
    %c0_i32_1 = arith.constant 0 : i32
    return %arg0, %c0_i32, %c0_i32_0 : i32, i32, i32
  }
  func.func @transform_1(%arg0: i32) -> (i32, i32) {
    %c0_i32 = arith.constant 0 : i32
    %c0_i32_0 = arith.constant 0 : i32
    %c0_i32_1 = arith.constant 0 : i32
    return %c0_i32, %c0_i32_0 : i32, i32
  }
  func.func @transform_2(%arg0: i32) -> (i32, i32) {
    %c0_i32 = arith.constant 0 : i32
    %c0_i32_0 = arith.constant 0 : i32
    %c0_i32_1 = arith.constant 0 : i32
    return %c0_i32, %c0_i32_0 : i32, i32
  }
  func.func @transform_3(%arg0: i32) -> (i32, i32) {
    %c0_i32 = arith.constant 0 : i32
    %c0_i32_0 = arith.constant 0 : i32
    %c0_i32_1 = arith.constant 0 : i32
    return %c0_i32, %c0_i32_0 : i32, i32
  }
  func.func @transform_4(%arg0: i32) -> (i32, i32) {
    %c0_i32 = arith.constant 0 : i32
    %c0_i32_0 = arith.constant 0 : i32
    %c0_i32_1 = arith.constant 0 : i32
    return %c0_i32, %c0_i32_0 : i32, i32
  }
  func.func @transform_5(%arg0: i32) -> (i32, i32) {
    %c0_i32 = arith.constant 0 : i32
    %c0_i32_0 = arith.constant 0 : i32
    %c0_i32_1 = arith.constant 0 : i32
    return %c0_i32, %c0_i32_0 : i32, i32
  }
  func.func @transform_6(%arg0: i32) -> (i32, i32) {
    %c0_i32 = arith.constant 0 : i32
    %c0_i32_0 = arith.constant 0 : i32
    %c0_i32_1 = arith.constant 0 : i32
    return %c0_i32, %c0_i32_0 : i32, i32
  }
  func.func @transform_7(%arg0: i32) -> (i32, i32) {
    %c0_i32 = arith.constant 0 : i32
    %c0_i32_0 = arith.constant 0 : i32
    %c0_i32_1 = arith.constant 0 : i32
    return %c0_i32, %c0_i32_0 : i32, i32
  }
  func.func @transform_8(%arg0: i32) -> (i32, i32, i32) {
    %c0_i32 = arith.constant 0 : i32
    %c0_i32_0 = arith.constant 0 : i32
    %c0_i32_1 = arith.constant 0 : i32
    return %arg0, %c0_i32, %c0_i32_0 : i32, i32, i32
  }
}

module attributes {stable_mosaic.version = 11 : i64} {
  func.func @fpa_kernel(%arg0: i32, %arg1: memref<1x64x256xf32, #tpu.memory_space<vmem>>, %arg2: memref<16x64xf32, #tpu.memory_space<vmem>>, %arg3: memref<256x64xf32, #tpu.memory_space<vmem>>, %arg4: memref<64x256xf32, #tpu.memory_space<vmem>>, %arg5: memref<256x16xf32, #tpu.memory_space<vmem>>, %arg6: memref<16x256xf32, #tpu.memory_space<vmem>>, %arg7: memref<64x48xf32, #tpu.memory_space<vmem>>, %arg8: memref<64x1xf32, #tpu.memory_space<vmem>>, %arg9: memref<1x64x256xf32, #tpu.memory_space<vmem>>) attributes {dimension_semantics = [#tpu.dimension_semantics<parallel>], iteration_bounds = array<i64: 2>, scalar_prefetch = 0 : i64, scratch_operands = 0 : i64, tpu.core_type = #tpu.core_type<tc>, window_params = [{transform_indices = @transform_0, window_bounds = array<i64: 1, 64, 256>}, {pipeline_mode = #tpu.pipeline_mode<synchronous>, transform_indices = @transform_1, window_bounds = array<i64: 16, 64>}, {pipeline_mode = #tpu.pipeline_mode<synchronous>, transform_indices = @transform_2, window_bounds = array<i64: 256, 64>}, {pipeline_mode = #tpu.pipeline_mode<synchronous>, transform_indices = @transform_3, window_bounds = array<i64: 64, 256>}, {pipeline_mode = #tpu.pipeline_mode<synchronous>, transform_indices = @transform_4, window_bounds = array<i64: 256, 16>}, {pipeline_mode = #tpu.pipeline_mode<synchronous>, transform_indices = @transform_5, window_bounds = array<i64: 16, 256>}, {pipeline_mode = #tpu.pipeline_mode<synchronous>, transform_indices = @transform_6, window_bounds = array<i64: 64, 48>}, {pipeline_mode = #tpu.pipeline_mode<synchronous>, transform_indices = @transform_7, window_bounds = array<i64: 64, 1>}, {transform_indices = @transform_8, window_bounds = array<i64: 1, 64, 256>}]} {
    %c0 = arith.constant 0 : index
    %c0_0 = arith.constant 0 : index
    %c0_1 = arith.constant 0 : index
    %0 = vector.load %arg1[%c0, %c0_0, %c0_1] : memref<1x64x256xf32, #tpu.memory_space<vmem>>, vector<1x64x256xf32>
    %1 = vector.shape_cast %0 : vector<1x64x256xf32> to vector<64x256xf32>
    %c0_2 = arith.constant 0 : index
    %c0_3 = arith.constant 0 : index
    %2 = vector.load %arg2[%c0_2, %c0_3] : memref<16x64xf32, #tpu.memory_space<vmem>>, vector<16x64xf32>
    %cst = arith.constant dense<0.000000e+00> : vector<16x256xf32>
    %3 = tpu.matmul %2, %1, %cst {dimension_numbers = #tpu.dot_dimension_numbers<[1], [0], [0], [1], [0, 0, 1, 1], [], []>} : vector<16x64xf32>, vector<64x256xf32>, vector<16x256xf32> -> vector<16x256xf32>
    %c0_4 = arith.constant 0 : index
    %c0_5 = arith.constant 0 : index
    %4 = vector.load %arg3[%c0_4, %c0_5] : memref<256x64xf32, #tpu.memory_space<vmem>>, vector<256x64xf32>
    %cst_6 = arith.constant dense<0.000000e+00> : vector<16x64xf32>
    %5 = tpu.matmul %3, %4, %cst_6 {dimension_numbers = #tpu.dot_dimension_numbers<[1], [0], [0], [1], [0, 0, 1, 1], [], []>} : vector<16x256xf32>, vector<256x64xf32>, vector<16x64xf32> -> vector<16x64xf32>
    %c0_7 = arith.constant 0 : index
    %c0_8 = arith.constant 0 : index
    %6 = vector.load %arg4[%c0_7, %c0_8] : memref<64x256xf32, #tpu.memory_space<vmem>>, vector<64x256xf32>
    %cst_9 = arith.constant dense<0.000000e+00> : vector<16x256xf32>
    %7 = tpu.matmul %5, %6, %cst_9 {dimension_numbers = #tpu.dot_dimension_numbers<[1], [0], [0], [1], [0, 0, 1, 1], [], []>} : vector<16x64xf32>, vector<64x256xf32>, vector<16x256xf32> -> vector<16x256xf32>
    %c0_10 = arith.constant 0 : index
    %c0_11 = arith.constant 0 : index
    %8 = vector.load %arg5[%c0_10, %c0_11] : memref<256x16xf32, #tpu.memory_space<vmem>>, vector<256x16xf32>
    %cst_12 = arith.constant dense<0.000000e+00> : vector<16x16xf32>
    %9 = tpu.matmul %3, %8, %cst_12 {dimension_numbers = #tpu.dot_dimension_numbers<[1], [0], [0], [1], [0, 0, 1, 1], [], []>} : vector<16x256xf32>, vector<256x16xf32>, vector<16x16xf32> -> vector<16x16xf32>
    %c0_13 = arith.constant 0 : index
    %c0_14 = arith.constant 0 : index
    %10 = vector.load %arg6[%c0_13, %c0_14] : memref<16x256xf32, #tpu.memory_space<vmem>>, vector<16x256xf32>
    %cst_15 = arith.constant dense<0.000000e+00> : vector<16x256xf32>
    %11 = tpu.matmul %9, %10, %cst_15 {dimension_numbers = #tpu.dot_dimension_numbers<[1], [0], [0], [1], [0, 0, 1, 1], [], []>} : vector<16x16xf32>, vector<16x256xf32>, vector<16x256xf32> -> vector<16x256xf32>
    %12 = tpu.concatenate %3, %7, %11 in 0 : vector<16x256xf32>, vector<16x256xf32>, vector<16x256xf32> -> vector<48x256xf32>
    %c0_16 = arith.constant 0 : index
    %c0_17 = arith.constant 0 : index
    %13 = vector.load %arg7[%c0_16, %c0_17] : memref<64x48xf32, #tpu.memory_space<vmem>>, vector<64x48xf32>
    %cst_18 = arith.constant dense<0.000000e+00> : vector<64x256xf32>
    %14 = tpu.matmul %13, %12, %cst_18 {dimension_numbers = #tpu.dot_dimension_numbers<[1], [0], [0], [1], [0, 0, 1, 1], [], []>} : vector<64x48xf32>, vector<48x256xf32>, vector<64x256xf32> -> vector<64x256xf32>
    %c0_19 = arith.constant 0 : index
    %c0_20 = arith.constant 0 : index
    %15 = vector.load %arg8[%c0_19, %c0_20] : memref<64x1xf32, #tpu.memory_space<vmem>>, vector<64x1xf32>
    %16 = vector.broadcast %15 : vector<64x1xf32> to vector<64x256xf32>
    %17 = arith.addf %14, %16 : vector<64x256xf32>
    %cst_21 = arith.constant 0.000000e+00 : f32
    %18 = vector.broadcast %cst_21 : f32 to vector<64x256xf32>
    %19 = arith.maximumf %17, %18 : vector<64x256xf32>
    %20 = arith.addf %19, %1 : vector<64x256xf32>
    %c0_22 = arith.constant 0 : index
    %c0_23 = arith.constant 0 : index
    %c0_24 = arith.constant 0 : index
    %21 = vector.load %arg9[%c0_22, %c0_23, %c0_24] : memref<1x64x256xf32, #tpu.memory_space<vmem>>, vector<1x64x256xf32>
    %22 = vector.shape_cast %21 : vector<1x64x256xf32> to vector<64x256xf32>
    %23 = vector.shape_cast %20 : vector<64x256xf32> to vector<1x64x256xf32>
    tpu.vector_store %arg9[%c0_22, %c0_23, %c0_24], %23 {strides = array<i32>} : memref<1x64x256xf32, #tpu.memory_space<vmem>>, vector<1x64x256xf32>,
    return
  }
  func.func @transform_0(%arg0: i32) -> (i32, i32, i32) {
    %c0_i32 = arith.constant 0 : i32
    %c0_i32_0 = arith.constant 0 : i32
    %c0_i32_1 = arith.constant 0 : i32
    return %arg0, %c0_i32, %c0_i32_0 : i32, i32, i32
  }
  func.func @transform_1(%arg0: i32) -> (i32, i32) {
    %c0_i32 = arith.constant 0 : i32
    %c0_i32_0 = arith.constant 0 : i32
    %c0_i32_1 = arith.constant 0 : i32
    return %c0_i32, %c0_i32_0 : i32, i32
  }
  func.func @transform_2(%arg0: i32) -> (i32, i32) {
    %c0_i32 = arith.constant 0 : i32
    %c0_i32_0 = arith.constant 0 : i32
    %c0_i32_1 = arith.constant 0 : i32
    return %c0_i32, %c0_i32_0 : i32, i32
  }
  func.func @transform_3(%arg0: i32) -> (i32, i32) {
    %c0_i32 = arith.constant 0 : i32
    %c0_i32_0 = arith.constant 0 : i32
    %c0_i32_1 = arith.constant 0 : i32
    return %c0_i32, %c0_i32_0 : i32, i32
  }
  func.func @transform_4(%arg0: i32) -> (i32, i32) {
    %c0_i32 = arith.constant 0 : i32
    %c0_i32_0 = arith.constant 0 : i32
    %c0_i32_1 = arith.constant 0 : i32
    return %c0_i32, %c0_i32_0 : i32, i32
  }
  func.func @transform_5(%arg0: i32) -> (i32, i32) {
    %c0_i32 = arith.constant 0 : i32
    %c0_i32_0 = arith.constant 0 : i32
    %c0_i32_1 = arith.constant 0 : i32
    return %c0_i32, %c0_i32_0 : i32, i32
  }
  func.func @transform_6(%arg0: i32) -> (i32, i32) {
    %c0_i32 = arith.constant 0 : i32
    %c0_i32_0 = arith.constant 0 : i32
    %c0_i32_1 = arith.constant 0 : i32
    return %c0_i32, %c0_i32_0 : i32, i32
  }
  func.func @transform_7(%arg0: i32) -> (i32, i32) {
    %c0_i32 = arith.constant 0 : i32
    %c0_i32_0 = arith.constant 0 : i32
    %c0_i32_1 = arith.constant 0 : i32
    return %c0_i32, %c0_i32_0 : i32, i32
  }
  func.func @transform_8(%arg0: i32) -> (i32, i32, i32) {
    %c0_i32 = arith.constant 0 : i32
    %c0_i32_0 = arith.constant 0 : i32
    %c0_i32_1 = arith.constant 0 : i32
    return %arg0, %c0_i32, %c0_i32_0 : i32, i32, i32
  }
}

</mosaic_0001>

<bundles_post_ra>
// kernel: tpu_custom_call.1
= control target key start
LH: loop header
LB: loop body
LE: loop exit
PB: predicated region body
PF: predicated region fallthrough
CT: control target
= control target key end

     0   :  { %13 = vsyncpa [#allocation3], 0  ;;  %s2055_s0 = inlined_call_operand.vmem [shape: f32[2,64,256], index: 0, kind: input, shape index: {}]   ;;  %s2056_s1 = inlined_call_operand.vmem [shape: f32[16,64], index: 1, kind: input, shape index: {}]   ;;  %s2057_s2 = inlined_call_operand.vmem [shape: f32[256,64], index: 2, kind: input, shape index: {}]   ;;  %s2058_s3 = inlined_call_operand.vmem [shape: f32[64,256], index: 3, kind: input, shape index: {}]   ;;  %s2059_s4 = inlined_call_operand.vmem [shape: f32[256,16], index: 4, kind: input, shape index: {}]   ;;  %s2060_s5 = inlined_call_operand.vmem [shape: f32[16,256], index: 5, kind: input, shape index: {}]   ;;  %s2061_s6 = inlined_call_operand.vmem [shape: f32[64,48], index: 6, kind: input, shape index: {}]   ;;  %s2062_s7 = inlined_call_operand.vmem [shape: f32[64,1], index: 7, kind: input, shape index: {}]   ;;  %s2063_s8 = inlined_call_operand.hbm [shape: f32[2,64,256], index: 8, kind: output, shape index: {}]  }
   0x1   :  { %15 = vsyncpa [#allocation3 + $0x1], 0  ;;  %s1500_s27 = smov 0   ;;  %s1502_s28 = smov 0  }
   0x2   :  { %s1504_s29 = smov 0   ;;  %s1506_s30 = smov 0  }
   0x3 LB: > { %s1521_s9 = sadd.s32 4294967295, %s1448_s30   ;;  %s1125_s10 = sadd.s32 4294967294, %s1448_s30   ;;  %s1448_s30 = sphi %s1506_s30, %s2069_s30   ;;  %s1444_s29 = sphi %s1504_s29, %s2068_s29   ;;  %s1440_s28 = sphi %s1502_s28, %s2067_s28   ;;  %s1436_s27 = sphi %s1500_s27, %s2066_s27  }
   0x4   : > { %s1525_s11 = sadd.s32 1, %s1448_s30   ;;  %s201_s12 = sadd.s32 1, %s1444_s29 }
   0x5   : > { %s198_s13 = ssub.s32 %s1448_s30, %s1525_s11  ;;  %p211_p0 = scmp.ne.s32.totalorder %s1444_s29, %s1440_s28 }
   0x6   : > { %p199_p1 = scmp.eq.s32.totalorder %s198_s13, 0  ;;  %p212_p2 = scmp.eq.s32.totalorder %s1521_s9, 1 }
   0x7   : > { %p217_p3 = scmp.ne.s32.totalorder %s1440_s28, %s1436_s27  ;;  %p218_p4 = scmp.eq.s32.totalorder %s1125_s10, 1 }
   0x8   : > { %s1536_s14 = scalar_select %p199_p1, %s1444_s29, %s201_s12  }
   0x9   : > { %p1538_p5 = por %p212_p2, %p211_p0  ;;  %p1542_p6 = por %p218_p4, %p217_p3 }
   0xa   : > { %p1128_p7 = scmp.ge.s32.totalorder %s1448_s30, 1  ;;  %p265_p8 = scmp.lt.s32.totalorder %s1448_s30, 3 }
   0xc   : > { %p266_p9 = pnand %p1128_p7, %p265_p8 }
   0xd   : > { %p299_p10 = scmp.lt.s32.totalorder (!%p266_p9), %s1521_s9, 1  ;;  %v422_v0 = vld [vmem:[%s2057_s2 + $0x80] sm:$0xff] (!%p266_p9)  ;;  %v1450_v1 = vmov (!%p266_p9), 0.0   ;;  %v423_v2 = vld [vmem:[%s2057_s2 + $0x88] sm:$0xff] (!%p266_p9)  ;;  %v424_v7 = vld [vmem:[%s2057_s2 + $0x90] sm:$0xff] (!%p266_p9)  ;;  %vm322_vm0 = vcmask (!%p266_p9), 523264  }
   0xe   : > { %269 = sbr.rel (%p266_p9) target bundleno = 1205 (0x4b5), region = 52  ;;  %393 = vmatprep.mubr.f32.mxu0 (!%p266_p9), %v1450_v1  ;;  %v406_v3 = vld [vmem:[%s2057_s2] sm:$0xff] (!%p266_p9)  ;;  %v407_v4 = vld [vmem:[%s2057_s2 + $0x8] sm:$0xff] (!%p266_p9)  ;;  %v1245_v5 = vpack.c.bf16 (!%p266_p9), %v423_v2, %v422_v0  ;;  %v425_v8 = vld [vmem:[%s2057_s2 + $0x98] sm:$0xff] (!%p266_p9)  ;;  %vm723_vm1 = vcmask (!%p266_p9), 130048   ;;  %vm863_vm2 = vcmask (!%p266_p9), 392192  }
   0xf   : > { %v1247_v6 = vpack.c.bf16 (!%p266_p9), %v407_v4, %v406_v3  ;;  %v408_v9 = vld [vmem:[%s2057_s2 + $0x10] sm:$0xff] (!%p266_p9)  ;;  %v1249_v10 = vpack.c.bf16 (!%p266_p9), %v425_v8, %v424_v7  ;;  %v409_v11 = vld [vmem:[%s2057_s2 + $0x18] sm:$0xff] (!%p266_p9)  ;;  %v426_v12 = vld [vmem:[%s2057_s2 + $0xa0] sm:$0xff] (!%p266_p9)  ;;  %s296_s19 = sand.u32 (!%p266_p9), 1, %s1440_s28   ;;  %s1152_s22 = sshll.u32 (!%p266_p9), %s1521_s9, 11 }
  0x10   : > { %v427_v13 = vld [vmem:[%s2057_s2 + $0xa8] sm:$0xff] (!%p266_p9)  ;;  %1246 = vmatprep.subr.bf16.mxu1 (!%p266_p9), %v1245_v5  ;;  %v410_v14 = vld [vmem:[%s2057_s2 + $0x20] sm:$0xff] (!%p266_p9)  ;;  %v1251_v15 = vpack.c.bf16 (!%p266_p9), %v409_v11, %v408_v9  ;;  %v428_v17 = vld [vmem:[%s2057_s2 + $0xb0] sm:$0xff] (!%p266_p9)  ;;  %s1129_s20 = sshll.u32 (!%p266_p9), %s296_s19, 7  ;;  %s2005_s10 = scalar_lea.hbm (!%p266_p9), %s2063_s8, %s1152_s22 }
  0x11   : > { %1248 = vmatpush3.bf16.msra.mxu1 (!%p266_p9), %v1247_v6  ;;  %v411_v16 = vld [vmem:[%s2057_s2 + $0x28] sm:$0xff] (!%p266_p9)  ;;  %v429_v18 = vld [vmem:[%s2057_s2 + $0xb8] sm:$0xff] (!%p266_p9)  ;;  %v1253_v22 = vpack.c.bf16 (!%p266_p9), %v427_v13, %v426_v12  ;;  %v412_v37 = vld [vmem:[%s2057_s2 + $0x30] sm:$0xff] (!%p266_p9)  ;;  %s1971_s21 = scalar_lea.vmem (!%p266_p9), [#allocation2], %s1129_s20  ;;  %s1452_s13 = smov (!%p266_p9), [#allocation2]  }
  0x12   : > { %1250 = vmatprep.subr.bf16.mxu1 (!%p266_p9), %v1249_v10  ;;  %v1255_v33 = vpack.c.bf16 (!%p266_p9), %v411_v16, %v410_v14  ;;  %v1257_v36 = vpack.c.bf16 (!%p266_p9), %v429_v18, %v428_v17  ;;  %v413_v38 = vld [vmem:[%s2057_s2 + $0x38] sm:$0xff] (!%p266_p9)  ;;  %v430_v41 = vld [vmem:[%s2057_s2 + $0xc0] sm:$0xff] (!%p266_p9)  ;;  %v431_v42 = vld [vmem:[%s2057_s2 + $0xc8] sm:$0xff] (!%p266_p9)  ;;  %s1063_s23 = sshll.u32 (!%p266_p9), %s1971_s21, 4  ;;  %s1390_s17 = sshll.u32 (!%p266_p9), %s1452_s13, 4  ;;  %s2007_s23 = int_to_ptr.vmem [resolvable:$true] %s1063_s23  ;;  %s1391_s17 = int_to_ptr.vmem [resolvable:$false] %s1390_s17 }
  0x13   : > { %v1259_v45 = vpack.c.bf16 (!%p266_p9), %v413_v38, %v412_v37  ;;  %v1261_v48 = vpack.c.bf16 (!%p266_p9), %v431_v42, %v430_v41  ;;  %v414_v49 = vld [vmem:[%s2057_s2 + $0x40] sm:$0xff] (!%p266_p9)  ;;  %v415_v50 = vld [vmem:[%s2057_s2 + $0x48] sm:$0xff] (!%p266_p9)  ;;  %v432_v53 = vld [vmem:[%s2057_s2 + $0xd0] sm:$0xff] (!%p266_p9)  ;;  %s1386_s12 = scalar_lea.vmem (!%p266_p9), %s2007_s23, 2048  ;;  %p1393_p0 = scmp.lt.s32.totalorder (!%p266_p9), %s2007_s23, %s1391_s17 }
  0x14   : > { %v433_v54 = vld [vmem:[%s2057_s2 + $0xd8] sm:$0xff] (!%p266_p9)  ;;  %v1263_v55 = vpack.c.bf16 (!%p266_p9), %v415_v50, %v414_v49  ;;  %v416_v58 = vld [vmem:[%s2057_s2 + $0x50] sm:$0xff] (!%p266_p9)  ;;  %v434_v60 = vld [vmem:[%s2057_s2 + $0xe0] sm:$0xff] (!%p266_p9)  ;;  %p1387_p11 = scmp.ne.s32.totalorder (!%p266_p9), %s2007_s23, %s1386_s12 }
  0x15   : > { %s300_s25 = scalar_select %p299_p10, %s1521_s9, 1  ;;  %1252 = vmatpush3.bf16.msra.mxu1 %v1251_v15  ;;  %v1265_v57 = vpack.c.bf16 %v433_v54, %v432_v53  ;;  %v417_v59 = vld [vmem:[%s2057_s2 + $0x58] sm:$0xff]  ;;  %v435_v61 = vld [vmem:[%s2057_s2 + $0xe8] sm:$0xff]  ;;  %v320_v63 = vld [vmem:[%s2056_s1] sm:$0xff] }
  0x16   : > { %1254 = vmatprep.subr.bf16.mxu1 %v1253_v22  ;;  %v1267_v62 = vpack.c.bf16 %v417_v59, %v416_v58  ;;  %v1269_v0 = vpack.c.bf16 %v435_v61, %v434_v60  ;;  %v418_v2 = vld [vmem:[%s2057_s2 + $0x60] sm:$0xff]  ;;  %v419_v3 = vld [vmem:[%s2057_s2 + $0x68] sm:$0xff]  ;;  %v436_v4 = vld [vmem:[%s2057_s2 + $0xf0] sm:$0xff]  ;;  %s2014_s9 = scalar_lea.sflag [#allocation3], %s296_s19  ;;  %p1388_p12 = pnand %p1387_p11, %p1538_p5 }
  0x17   : > { %s1151_s26 = sshll.u32 %s300_s25, 7  ;;  %v437_v5 = vld [vmem:[%s2057_s2 + $0xf8] sm:$0xff]  ;;  %v1271_v6 = vpack.c.bf16 %v419_v3, %v418_v2  ;;  %v321_v7 = vld [vmem:[%s2056_s1 + $0x8] sm:$0xff]  ;;  %v420_v9 = vld [vmem:[%s2057_s2 + $0x70] sm:$0xff] }
  0x18   : > { %s1587_s18 = scalar_lea.vmem %s2055_s0, %s1151_s26  ;;  %v1273_v8 = vpack.c.bf16 %v437_v5, %v436_v4  ;;  %v421_v10 = vld [vmem:[%s2057_s2 + $0x78] sm:$0xff]  ;;  %v514_v12 = vld [vmem:[%s2058_s3 + $0x8] sm:$0xff]  ;;  %v513_v14 = vld [vmem:[%s2058_s3] sm:$0xff]  ;;  %p1389_p13 = pneg %p1388_p12 }
  0x19   : > { %v1599_v19 = vld [vmem:[%s1587_s18 + $0x8] sm:$0xff]  ;;  %v1602_v20 = vld [vmem:[%s1587_s18 + $0x18] sm:$0xff]  ;;  %v1605_v21 = vld [vmem:[%s1587_s18] sm:$0xff]  ;;  %1256 = vmatpush3.bf16.msra.mxu1 %v1255_v33  ;;  %v1275_v11 = vpack.c.bf16 %v421_v10, %v420_v9 }
  0x1a   : > { %v1229_v23 = vpack.c.bf16 %v1602_v20, %v1599_v19  ;;  %v1610_v24 = vld [vmem:[%s1587_s18 + $0x10] sm:$0xff]  ;;  %v1613_v25 = vld [vmem:[%s1587_s18 + $0x28] sm:$0xff]  ;;  %v1616_v26 = vld [vmem:[%s1587_s18 + $0x38] sm:$0xff]  ;;  %1258 = vmatprep.subr.bf16.mxu1 %v1257_v36 }
  0x1b   : > { %v1231_v27 = vpack.c.bf16 %v1610_v24, %v1605_v21  ;;  %v1233_v28 = vpack.c.bf16 %v1616_v26, %v1613_v25  ;;  %v1623_v29 = vld [vmem:[%s1587_s18 + $0x20] sm:$0xff]  ;;  %v1626_v30 = vld [vmem:[%s1587_s18 + $0x30] sm:$0xff]  ;;  %v1629_v31 = vld [vmem:[%s1587_s18 + $0x48] sm:$0xff] }
  0x1c   : > { %1230 = vmatprep.subr.bf16.mxu0 %v1229_v23  ;;  %v1632_v32 = vld [vmem:[%s1587_s18 + $0x58] sm:$0xff]  ;;  %v1235_v34 = vpack.c.bf16 %v1626_v30, %v1623_v29  ;;  %v1637_v35 = vld [vmem:[%s1587_s18 + $0x40] sm:$0xff]  ;;  %v1648_v40 = vld [vmem:[%s1587_s18 + $0x50] sm:$0xff] }
  0x1d   : > { %1232 = vmatpush1.bf16.msra.mxu0 %v1231_v27  ;;  %v1237_v39 = vpack.c.bf16 %v1632_v32, %v1629_v31  ;;  %v1657_v43 = vld [vmem:[%s1587_s18 + $0x68] sm:$0xff]  ;;  %v1660_v44 = vld [vmem:[%s1587_s18 + $0x78] sm:$0xff]  ;;  %v1239_v46 = vpack.c.bf16 %v1648_v40, %v1637_v35  ;;  %v1665_v47 = vld [vmem:[%s1587_s18 + $0x60] sm:$0xff]  ;;  %1260 = vmatpush3.bf16.msra.mxu1 %v1259_v45 }
  0x1e   : > { %1234 = vmatprep.subr.bf16.mxu0 %v1233_v28  ;;  %v1241_v51 = vpack.c.bf16 %v1660_v44, %v1657_v43  ;;  %v1676_v52 = vld [vmem:[%s1587_s18 + $0x70] sm:$0xff]  ;;  %1262 = vmatprep.subr.bf16.mxu1 %v1261_v48  ;;  %v516_v13 = vld [vmem:[%s2058_s3 + $0x18] sm:$0xff]  ;;  %v518_v17 = vld [vmem:[%s2058_s3 + $0x28] sm:$0xff]  ;;  %s1392_s18 = scalar_lea.vmem %s1391_s17, 4096 }
  0x1f   : > { %v1243_v56 = vpack.c.bf16 %v1676_v52, %v1665_v47  ;;  %v1277_v15 = vpack.c.bf16 %v516_v13, %v514_v12  ;;  %v515_v16 = vld [vmem:[%s2058_s3 + $0x10] sm:$0xff]  ;;  %v520_v18 = vld [vmem:[%s2058_s3 + $0x38] sm:$0xff]  ;;  %v517_v27 = vld [vmem:[%s2058_s3 + $0x20] sm:$0xff]  ;;  %p1394_p1 = scmp.lt.s32.totalorder %s1392_s18, %s1386_s12 }
  0x20   : > { %v1279_v22 = vpack.c.bf16 %v515_v16, %v513_v14  ;;  %v1281_v23 = vpack.c.bf16 %v520_v18, %v518_v17  ;;  %v519_v28 = vld [vmem:[%s2058_s3 + $0x30] sm:$0xff]  ;;  %v522_v33 = vld [vmem:[%s2058_s3 + $0x48] sm:$0xff]  ;;  %v521_v38 = vld [vmem:[%s2058_s3 + $0x40] sm:$0xff] }
  0x21   : > { %1236 = vmatpush1.bf16.msra.mxu0 %v1235_v34  ;;  %1264 = vmatpush3.bf16.msra.mxu1 %v1263_v55  ;;  %v524_v34 = vld [vmem:[%s2058_s3 + $0x58] sm:$0xff]  ;;  %v1283_v36 = vpack.c.bf16 %v519_v28, %v517_v27  ;;  %v526_v41 = vld [vmem:[%s2058_s3 + $0x68] sm:$0xff]  ;;  %v525_v55 = vld [vmem:[%s2058_s3 + $0x60] sm:$0xff]  ;;  %p1395_p2 = por %p1394_p1, %p1393_p0 }
  0x22   : > { %1238 = vmatprep.subr.bf16.mxu0 %v1237_v39  ;;  %1266 = vmatprep.subr.bf16.mxu1 %v1265_v57  ;;  %v1285_v37 = vpack.c.bf16 %v524_v34, %v522_v33  ;;  %v523_v39 = vld [vmem:[%s2058_s3 + $0x50] sm:$0xff]  ;;  %v528_v42 = vld [vmem:[%s2058_s3 + $0x78] sm:$0xff]  ;;  %v628_v58 = vld [vmem:[%s2059_s4 + $0x80] sm:$0xff] }
  0x23   : > { %v1287_v45 = vpack.c.bf16 %v523_v39, %v521_v38  ;;  %v629_v59 = vld [vmem:[%s2059_s4 + $0x88] sm:$0xff]  ;;  %v612_v61 = vld [vmem:[%s2059_s4] sm:$0xff]  ;;  %v634_v18 = vld [vmem:[%s2059_s4 + $0xb0] sm:$0xff]  ;;  %p1396_p3 = pnand %p1395_p2, %p1389_p13 }
  0x24   : > { %v1293_v60 = vpack.c.bf16 %v629_v59, %v628_v58  ;;  %v632_v9 = vld [vmem:[%s2059_s4 + $0xa0] sm:$0xff]  ;;  %v633_v10 = vld [vmem:[%s2059_s4 + $0xa8] sm:$0xff]  ;;  %v618_v28 = vld [vmem:[%s2059_s4 + $0x30] sm:$0xff] }
  0x25   : > { %1240 = vmatpush1.bf16.msra.mxu0 %v1239_v46  ;;  %1268 = vmatpush3.bf16.msra.mxu1 %v1267_v62  ;;  %v1289_v46 = vpack.c.bf16 %v528_v42, %v526_v41  ;;  %v613_v62 = vld [vmem:[%s2059_s4 + $0x8] sm:$0xff]  ;;  %v616_v16 = vld [vmem:[%s2059_s4 + $0x20] sm:$0xff]  ;;  %v619_v33 = vld [vmem:[%s2059_s4 + $0x38] sm:$0xff] }
  0x26   : > { %1242 = vmatprep.subr.bf16.mxu0 %v1241_v51  ;;  %1270 = vmatprep.subr.bf16.mxu1 %v1269_v0  ;;  %v631_v0 = vld [vmem:[%s2059_s4 + $0x98] sm:$0xff]  ;;  %v1295_v4 = vpack.c.bf16 %v613_v62, %v612_v61  ;;  %v617_v17 = vld [vmem:[%s2059_s4 + $0x28] sm:$0xff]  ;;  %v636_v34 = vld [vmem:[%s2059_s4 + $0xc0] sm:$0xff] }
  0x27   : > { %v620_v39 = vld [vmem:[%s2059_s4 + $0x40] sm:$0xff]  ;;  %v621_v41 = vld [vmem:[%s2059_s4 + $0x48] sm:$0xff]  ;;  %v638_v42 = vld [vmem:[%s2059_s4 + $0xd0] sm:$0xff] }
  0x28   : > { %v624_v59 = vld [vmem:[%s2059_s4 + $0x60] sm:$0xff]  ;;  %v642_v61 = vld [vmem:[%s2059_s4 + $0xf0] sm:$0xff]  ;;  %v643_v62 = vld [vmem:[%s2059_s4 + $0xf8] sm:$0xff] }
  0x29   : > { %1244 = vmatpush1.bf16.msra.mxu0 %v1243_v56  ;;  %1272 = vmatpush3.bf16.msra.mxu1 %v1271_v6  ;;  %v527_v56 = vld [vmem:[%s2058_s3 + $0x70] sm:$0xff] }
  0x2a   : > { %1274 = vmatprep.subr.bf16.mxu1 %v1273_v8  ;;  %1278 = vmatprep.subr.bf16.mxu0 %v1277_v15  ;;  %v1291_v57 = vpack.c.bf16 %v527_v56, %v525_v55  ;;  %v615_v8 = vld [vmem:[%s2059_s4 + $0x18] sm:$0xff]  ;;  %v1301_v15 = vpack.c.bf16 %v633_v10, %v632_v9  ;;  %v640_v55 = vld [vmem:[%s2059_s4 + $0xe0] sm:$0xff]  ;;  %v641_v56 = vld [vmem:[%s2059_s4 + $0xe8] sm:$0xff] }
  0x2b   : > { %v1317_v58 = vpack.c.bf16 %v641_v56, %v640_v55  ;;  %v808_v55 = vld [vmem:[%s2061_s6 + $0x8] sm:$0xff]  ;;  %v809_v56 = vld [vmem:[%s2061_s6 + $0x10] sm:$0xff] }
  0x2c   : > { %1132 = vmatmul.mubr.msk.f32.vlgmr.msra.gmra.mrb[0].mxu0 %vm322_vm0, %v320_v63  ;;  %v630_v63 = vld [vmem:[%s2059_s4 + $0x90] sm:$0xff] }
  0x2d   : > { %399 = vmatprep.mubr.f32.mxu0 %v1450_v1  ;;  %1276 = vmatpush3.bf16.msra.mxu1 %v1275_v11  ;;  %v1297_v6 = vpack.c.bf16 %v631_v0, %v630_v63  ;;  %v1321_v0 = vpack.c.bf16 %v643_v62, %v642_v61  ;;  %v814_v61 = vld [vmem:[%s2061_s6 + $0x38] sm:$0xff] }
  0x2e   : > { %1280 = vmatpush1.bf16.msra.mxu0 %v1279_v22  ;;  %v635_v22 = vld [vmem:[%s2059_s4 + $0xb8] sm:$0xff] }
  0x2f   : > { %1282 = vmatprep.subr.bf16.mxu0 %v1281_v23  ;;  %v1303_v23 = vpack.c.bf16 %v617_v17, %v616_v16  ;;  %v1305_v27 = vpack.c.bf16 %v635_v22, %v634_v18 }
  0x30   : > { %1133 = vmatmul.mubr.msk.f32.gmra.mrb[2].mxu0 %vm322_vm0, %v321_v7  ;;  %v614_v7 = vld [vmem:[%s2059_s4 + $0x10] sm:$0xff] }
  0x31   : > { %599 = vmatprep.mubr.f32.mxu0 %v1450_v1  ;;  %v1299_v13 = vpack.c.bf16 %v615_v8, %v614_v7  ;;  %v719_v7 = vld [vmem:[%s2060_s5] sm:$0xff] }
  0x32   : > { %1284 = vmatpush1.bf16.msra.mxu0 %v1283_v36  ;;  %v637_v36 = vld [vmem:[%s2059_s4 + $0xc8] sm:$0xff] }
  0x33   : > { %1286 = vmatprep.subr.bf16.mxu0 %v1285_v37  ;;  %v1307_v37 = vpack.c.bf16 %v619_v33, %v618_v28  ;;  %v1309_v38 = vpack.c.bf16 %v637_v36, %v636_v34  ;;  %v1451_v28 = vmov 0   ;;  %v816_v33 = vld [vmem:[%s2062_s7 + $0x8] sm:$0xff]  ;;  %v818_v34 = vld [vmem:[%s2062_s7 + $0x18] sm:$0xff] }
  0x34   : > { %1384 = vset.pattern.permute.xlu0 %v1451_v28  ;;  %1385 = vset.pattern.permute.xlu1 %v1451_v28  ;;  %v820_v36 = vld [vmem:[%s2062_s7 + $0x28] sm:$0xff] }
  0x36   : > { %1288 = vmatpush1.bf16.msra.mxu0 %v1287_v45  ;;  %v639_v45 = vld [vmem:[%s2059_s4 + $0xd8] sm:$0xff] }
  0x37   : > { %1290 = vmatprep.subr.bf16.mxu0 %v1289_v46  ;;  %v1311_v46 = vpack.c.bf16 %v621_v41, %v620_v39  ;;  %v821_v39 = vld [vmem:[%s2062_s7 + $0x30] sm:$0xff] }
  0x3a   : > { %1292 = vmatpush1.bf16.msra.mxu0 %v1291_v57 }
  0x3b   : > { %1294 = vmatprep.subr.bf16.mxu0 %v1293_v60  ;;  %v625_v60 = vld [vmem:[%s2059_s4 + $0x68] sm:$0xff] }
  0x3c   : > { %v1319_v63 = vpack.c.bf16 %v625_v60, %v624_v59  ;;  %v812_v59 = vld [vmem:[%s2061_s6 + $0x28] sm:$0xff]  ;;  %v813_v60 = vld [vmem:[%s2061_s6 + $0x30] sm:$0xff] }
  0xff   : > { %v1768_v48 = vpop.f32.mrb[0].mxu0 }
 0x100   : > { %v397_v49 = vpop.f32.mrb[1].mxu0 }
 0x101   : > { %502 = vmatprep.mubr.f32.mxu1 %v397_v49 }
 0x102   : > { %503 = vmatmul.mubr.f32.vlgmr.msra.gmra.mrb[0].mxu1 %v1768_v48 }
 0x103   : > { %v1771_v50 = vpop.f32.mrb[2].mxu0 }
 0x104   : > { %v1331_v51 = vpack.c.bf16 %v1771_v50, %v1768_v48  ;;  %v1775_v53 = vpop.f32.mrb[3].mxu0 }
 0x105   : > { %v1329_v54 = vpack.c.bf16 %v1775_v53, %v397_v49  ;;  %507 = vmatprep.mubr.f32.mxu1 %v1775_v53 }
 0x106   : > { %508 = vmatmul.mubr.f32.gmra.mrb[2].mxu1 %v1771_v50 }
 0x107   : > { %1330 = vmatprep.subr.bf16.mxu1 %v1329_v54  ;;  %952 = vmatprep.mubr.f32.mxu1 %v1450_v1  ;;  %v623_v54 = vld [vmem:[%s2059_s4 + $0x58] sm:$0xff] }
 0x108   : > { %1332 = vmatpush1.bf16.msra.mxu1 %v1331_v51  ;;  %v622_v51 = vld [vmem:[%s2059_s4 + $0x50] sm:$0xff] }
 0x109   : > { %v1315_v57 = vpack.c.bf16 %v623_v54, %v622_v51  ;;  %v807_v54 = vld [vmem:[%s2061_s6] sm:$0xff] }
 0x1d5   : > { %v1185_v2 = vpop.f32.mrb[0].mxu1 }
 0x1d6   : > { %v1186_v3 = vpop.f32.mrb[1].mxu1 }
 0x1d7   : > { %v1187_v5 = vadd.f32 %v1186_v3, %v1185_v2  ;;  %v626_v2 = vld [vmem:[%s2059_s4 + $0x70] sm:$0xff]  ;;  %v627_v3 = vld [vmem:[%s2059_s4 + $0x78] sm:$0xff] }
 0x1d9   : > { %v1188_v11 = vpop.f32.mrb[2].mxu1  ;;  %1134 = vmatmul.mubr.msk.f32.vlgmr.msra.gmra.mrb[4].mxu0 %vm322_vm0, %v1187_v5  ;;  %v720_v5 = vld [vmem:[%s2060_s5 + $0x8] sm:$0xff] }
 0x1da   : > { %1296 = vmatpush3.bf16.msra.mxu0 %v1295_v4  ;;  %v1189_v12 = vpop.f32.mrb[3].mxu1  ;;  %605 = vmatprep.mubr.f32.mxu0 %v1450_v1  ;;  %v1323_v4 = vpack.c.bf16 %v627_v3, %v626_v2 }
 0x1db   : > { %v1190_v14 = vadd.f32 %v1189_v12, %v1188_v11  ;;  %1298 = vmatprep.subr.bf16.mxu0 %v1297_v6  ;;  %v722_v6 = vld [vmem:[%s2060_s5 + $0x18] sm:$0xff] }
 0x1dc   : > { %v1325_v8 = vpack.c.bf16 %v722_v6, %v720_v5 }
 0x1dd   : > { %1135 = vmatmul.mubr.msk.f32.gmra.mrb[6].mxu0 %vm322_vm0, %v1190_v14 }
 0x1de   : > { %1300 = vmatpush3.bf16.msra.mxu0 %v1299_v13  ;;  %708 = vmatprep.mubr.f32.mxu0 %v397_v49  ;;  %v1313_v49 = vpack.c.bf16 %v639_v45, %v638_v42 }
 0x1df   : > { %1302 = vmatprep.subr.bf16.mxu0 %v1301_v15 }
 0x1e2   : > { %1304 = vmatpush3.bf16.msra.mxu0 %v1303_v23  ;;  %v815_v23 = vld [vmem:[%s2062_s7] sm:$0xff] }
 0x1e3   : > { %1306 = vmatprep.subr.bf16.mxu0 %v1305_v27  ;;  %v817_v27 = vld [vmem:[%s2062_s7 + $0x10] sm:$0xff]  ;;  %825 = vperm.xlu0 %1384, %v815_v23  }
 0x1e4   : > { %835 = vperm.xlu1 %1385, %v817_v27  }
 0x1e6   : > { %1308 = vmatpush3.bf16.msra.mxu0 %v1307_v37  ;;  %v819_v37 = vld [vmem:[%s2062_s7 + $0x20] sm:$0xff] }
 0x1e7   : > { %1310 = vmatprep.subr.bf16.mxu0 %v1309_v38  ;;  %830 = vperm.xlu0 %1384, %v816_v33   ;;  %v822_v38 = vld [vmem:[%s2062_s7 + $0x38] sm:$0xff] }
 0x1e8   : > { %840 = vperm.xlu1 %1385, %v818_v34  }
 0x1ea   : > { %1312 = vmatpush3.bf16.msra.mxu0 %v1311_v46 }
 0x1eb   : > { %1314 = vmatprep.subr.bf16.mxu0 %v1313_v49  ;;  %845 = vperm.xlu0 %1384, %v819_v37  }
 0x1ec   : > { %850 = vperm.xlu1 %1385, %v820_v36  }
 0x1ee   : > { %1316 = vmatpush3.bf16.msra.mxu0 %v1315_v57  ;;  %v810_v57 = vld [vmem:[%s2061_s6 + $0x18] sm:$0xff] }
 0x1ef   : > { %1318 = vmatprep.subr.bf16.mxu0 %v1317_v58  ;;  %855 = vperm.xlu0 %1384, %v821_v39   ;;  %v811_v58 = vld [vmem:[%s2061_s6 + $0x20] sm:$0xff] }
 0x1f0   : > { %860 = vperm.xlu1 %1385, %v822_v38  }
 0x1f2   : > { %1320 = vmatpush3.bf16.msra.mxu0 %v1319_v63 }
 0x1f3   : > { %1322 = vmatprep.subr.bf16.mxu0 %v1321_v0 }
 0x1f6   : > { %1324 = vmatpush3.bf16.msra.mxu0 %v1323_v4 }
 0x1f7   : > { %1326 = vmatprep.subr.bf16.mxu0 %v1325_v8 }
 0x1f9   : > { %709 = vmatmul.mubr.f32.vlgmr.msra.gmra.mrb[8].mxu0 %v1768_v48  ;;  %v721_v48 = vld [vmem:[%s2060_s5 + $0x10] sm:$0xff] }
 0x1fa   : > { %713 = vmatprep.mubr.f32.mxu0 %v1775_v53 }
 0x1fd   : > { %714 = vmatmul.mubr.f32.gmra.mrb[10].mxu0 %v1771_v50  ;;  %v1327_v50 = vpack.c.bf16 %v721_v48, %v719_v7 }
 0x1fe   : > { %794 = vmatprep.mubr.f32.mxu0 %v1450_v1 }
 0x1ff   : > { %1328 = vmatpush1.bf16.msra.mxu0 %v1327_v50 }
 0x262   : > { %v826_v62 = vpop.permute.xlu0 %825 }
 0x266   : > { %v831_v4 = vpop.permute.xlu0 %830 }
 0x2ac   : > { %v601_v53 = vpop.f32.mrb[4].mxu0 }
 0x2ad   : > { %v603_v9 = vpop.f32.mrb[5].mxu0 }
 0x2b0   : > { %v607_v10 = vpop.f32.mrb[6].mxu0 }
 0x2b1   : > { %v1335_v11 = vpack.c.bf16 %v607_v10, %v601_v53  ;;  %v609_v12 = vpop.f32.mrb[7].mxu0  ;;  %v836_v53 = vpop.permute.xlu1 %835 }
 0x2b2   : > { %v1333_v13 = vpack.c.bf16 %v609_v12, %v603_v9 }
 0x2b4   : > { %1334 = vmatprep.subr.bf16.mxu1 %v1333_v13 }
 0x2b5   : > { %1336 = vmatpush1.bf16.msra.mxu1 %v1335_v11 }
 0x2cc   : > { %v1223_v14 = vpop.f32.mrb[8].mxu0 }
 0x2cd   : > { %v1224_v15 = vpop.f32.mrb[9].mxu0 }
 0x2ce   : > { %v1225_v16 = vadd.f32 %v1224_v15, %v1223_v14 }
 0x2d0   : > { %v1226_v17 = vpop.f32.mrb[10].mxu0  ;;  %1136 = vmatmul.mubr.msk.f32.vlgmr.msra.gmra.mrb[12].mxu0 %vm723_vm1, %v1225_v16 }
 0x2d1   : > { %v1227_v18 = vpop.f32.mrb[11].mxu0  ;;  %800 = vmatprep.mubr.f32.mxu0 %v1450_v1 }
 0x2d2   : > { %v1228_v22 = vadd.f32 %v1227_v18, %v1226_v17  ;;  %v841_v17 = vpop.permute.xlu1 %840 }
 0x2d4   : > { %1137 = vmatmul.mubr.msk.f32.gmra.mrb[14].mxu0 %vm723_vm1, %v1228_v22 }
 0x3a3   : > { %v796_v41 = vpop.f32.mrb[12].mxu0 }
 0x3a4   : > { %v798_v42 = vpop.f32.mrb[13].mxu0 }
 0x3a7   : > { %v802_v45 = vpop.f32.mrb[14].mxu0 }
 0x3a8   : > { %v1339_v46 = vpack.c.bf16 %v802_v45, %v796_v41  ;;  %v804_v49 = vpop.f32.mrb[15].mxu0 }
 0x3a9   : > { %v1337_v51 = vpack.c.bf16 %v804_v49, %v798_v42 }
 0x3ab   : > { %1338 = vmatprep.subr.bf16.mxu1 %v1337_v51 }
 0x3ac   : > { %1340 = vmatpush1.bf16.msra.mxu1 %v1339_v46 }
 0x3af   : > { %1138 = vmatmul.mubr.msk.f32.vlgmr.msra.gmra.mrb[4].mxu1 %vm863_vm2, %v807_v54 }
 0x3b0   : > { %958 = vmatprep.mubr.f32.mxu1 %v1450_v1 }
 0x3b3   : > { %1139 = vmatmul.mubr.msk.f32.gmra.mrb[6].mxu1 %vm863_vm2, %v808_v55 }
 0x3b4   : > { %964 = vmatprep.mubr.f32.mxu1 %v1450_v1 }
 0x3b7   : > { %1140 = vmatmul.mubr.msk.f32.gmra.mrb[8].mxu1 %vm863_vm2, %v809_v56 }
 0x3b8   : > { %970 = vmatprep.mubr.f32.mxu1 %v1450_v1 }
 0x3bb   : > { %1141 = vmatmul.mubr.msk.f32.gmra.mrb[10].mxu1 %vm863_vm2, %v810_v57 }
 0x3bc   : > { %976 = vmatprep.mubr.f32.mxu1 %v1450_v1 }
 0x3bf   : > { %1142 = vmatmul.mubr.msk.f32.gmra.mrb[12].mxu1 %vm863_vm2, %v811_v58 }
 0x3c0   : > { %982 = vmatprep.mubr.f32.mxu1 %v1450_v1 }
 0x3c3   : > { %1143 = vmatmul.mubr.msk.f32.gmra.mrb[14].mxu1 %vm863_vm2, %v812_v59 }
 0x3c4   : > { %988 = vmatprep.mubr.f32.mxu1 %v1450_v1 }
 0x3c7   : > { %1144 = vmatmul.mubr.msk.f32.gmra.mrb[16].mxu1 %vm863_vm2, %v813_v60 }
 0x3c8   : > { %994 = vmatprep.mubr.f32.mxu1 %v1450_v1 }
 0x3cb   : > { %1145 = vmatmul.mubr.msk.f32.gmra.mrb[18].mxu1 %vm863_vm2, %v814_v61 }
 0x482   : > { %v954_v63 = vpop.f32.mrb[4].mxu1 }
 0x483   : > { %v955_v0 = vadd.f32 %v954_v63, %v826_v62  ;;  %v956_v2 = vpop.f32.mrb[5].mxu1 }
 0x484   : > { %v957_v3 = vadd.f32 %v956_v2, %v826_v62 }
 0x485   : > { %v1001_v5 = vmax.f32 %v955_v0, 0.0 }
 0x486   : > { %v1002_v6 = vmax.f32 %v957_v3, 0.0  ;;  %v960_v7 = vpop.f32.mrb[6].mxu1 }
 0x487   : > { %v1017_v1 = vadd.f32 %v1001_v5, %v1605_v21  ;;  %v961_v8 = vadd.f32 %v960_v7, %v831_v4  ;;  %v962_v48 = vpop.f32.mrb[7].mxu1 }
 0x488   : > { %v1018_v50 = vadd.f32 %v1002_v6, %v1599_v19  ;;  %v963_v9 = vadd.f32 %v962_v48, %v831_v4 }
 0x489   : > { %1033 = vst [vmem:[%s1971_s21] sm:$0xff] %v1017_v1  ;;  %v1003_v10 = vmax.f32 %v961_v8, 0.0 }
 0x48a   : > { %1034 = vst [vmem:[%s1971_s21 + $0x8] sm:$0xff] %v1018_v50  ;;  %v1004_v11 = vmax.f32 %v963_v9, 0.0  ;;  %v966_v12 = vpop.f32.mrb[8].mxu1 }
 0x48b   : > { %v1019_v13 = vadd.f32 %v1003_v10, %v1610_v24  ;;  %v967_v21 = vadd.f32 %v966_v12, %v836_v53  ;;  %v968_v14 = vpop.f32.mrb[9].mxu1 }
 0x48c   : > { %v1020_v19 = vadd.f32 %v1004_v11, %v1602_v20  ;;  %v969_v15 = vadd.f32 %v968_v14, %v836_v53  ;;  %v846_v20 = vpop.permute.xlu0 %845 }
 0x48d   : > { %1035 = vst [vmem:[%s1971_s21 + $0x10] sm:$0xff] %v1019_v13  ;;  %v1005_v16 = vmax.f32 %v967_v21, 0.0 }
 0x48e   : > { %1036 = vst [vmem:[%s1971_s21 + $0x18] sm:$0xff] %v1020_v19  ;;  %v1006_v18 = vmax.f32 %v969_v15, 0.0  ;;  %v972_v22 = vpop.f32.mrb[10].mxu1 }
 0x48f   : > { %v1021_v23 = vadd.f32 %v1005_v16, %v1623_v29  ;;  %v973_v27 = vadd.f32 %v972_v22, %v841_v17  ;;  %v974_v28 = vpop.f32.mrb[11].mxu1 }
 0x490   : > { %v1022_v24 = vadd.f32 %v1006_v18, %v1613_v25  ;;  %v975_v33 = vadd.f32 %v974_v28, %v841_v17  ;;  %v851_v25 = vpop.permute.xlu1 %850 }
 0x491   : > { %1037 = vst [vmem:[%s1971_s21 + $0x20] sm:$0xff] %v1021_v23  ;;  %v1007_v34 = vmax.f32 %v973_v27, 0.0 }
 0x492   : > { %1038 = vst [vmem:[%s1971_s21 + $0x28] sm:$0xff] %v1022_v24  ;;  %v1008_v36 = vmax.f32 %v975_v33, 0.0  ;;  %v978_v37 = vpop.f32.mrb[12].mxu1 }
 0x493   : > { %v1023_v38 = vadd.f32 %v1007_v34, %v1626_v30  ;;  %v979_v39 = vadd.f32 %v978_v37, %v846_v20  ;;  %v980_v41 = vpop.f32.mrb[13].mxu1 }
 0x494   : > { %v1024_v29 = vadd.f32 %v1008_v36, %v1616_v26  ;;  %v981_v42 = vadd.f32 %v980_v41, %v846_v20  ;;  %v856_v26 = vpop.permute.xlu0 %855  ;;  %v861_v0 = vpop.permute.xlu1 %860 }
 0x495   : > { %1039 = vst [vmem:[%s1971_s21 + $0x30] sm:$0xff] %v1023_v38  ;;  %v1009_v45 = vmax.f32 %v979_v39, 0.0 }
 0x496   : > { %1040 = vst [vmem:[%s1971_s21 + $0x38] sm:$0xff] %v1024_v29  ;;  %v1010_v46 = vmax.f32 %v981_v42, 0.0  ;;  %v984_v49 = vpop.f32.mrb[14].mxu1 }
 0x497   : > { %v1025_v51 = vadd.f32 %v1009_v45, %v1637_v35  ;;  %v985_v54 = vadd.f32 %v984_v49, %v851_v25  ;;  %v986_v55 = vpop.f32.mrb[15].mxu1 }
 0x498   : > { %v1026_v30 = vadd.f32 %v1010_v46, %v1629_v31  ;;  %v987_v56 = vadd.f32 %v986_v55, %v851_v25 }
 0x499   : > { %1041 = vst [vmem:[%s1971_s21 + $0x40] sm:$0xff] %v1025_v51  ;;  %v1011_v57 = vmax.f32 %v985_v54, 0.0 }
 0x49a   : > { %1042 = vst [vmem:[%s1971_s21 + $0x48] sm:$0xff] %v1026_v30  ;;  %v1012_v58 = vmax.f32 %v987_v56, 0.0  ;;  %v990_v59 = vpop.f32.mrb[16].mxu1 }
 0x49b   : > { %v1027_v60 = vadd.f32 %v1011_v57, %v1648_v40  ;;  %v991_v61 = vadd.f32 %v990_v59, %v856_v26  ;;  %v992_v62 = vpop.f32.mrb[17].mxu1 }
 0x49c   : > { %v1028_v35 = vadd.f32 %v1012_v58, %v1632_v32  ;;  %v993_v63 = vadd.f32 %v992_v62, %v856_v26 }
 0x49d   : > { %1043 = vst [vmem:[%s1971_s21 + $0x50] sm:$0xff] %v1027_v60  ;;  %v1013_v31 = vmax.f32 %v991_v61, 0.0 }
 0x49e   : > { %1044 = vst [vmem:[%s1971_s21 + $0x58] sm:$0xff] %v1028_v35  ;;  %v1014_v2 = vmax.f32 %v993_v63, 0.0  ;;  %v996_v3 = vpop.f32.mrb[18].mxu1 }
 0x49f   : > { %v1029_v4 = vadd.f32 %v1013_v31, %v1665_v47  ;;  %v997_v40 = vadd.f32 %v996_v3, %v861_v0  ;;  %v998_v5 = vpop.f32.mrb[19].mxu1 }
 0x4a0   : > { %v1030_v6 = vadd.f32 %v1014_v2, %v1657_v43  ;;  %v999_v7 = vadd.f32 %v998_v5, %v861_v0 }
 0x4a1   : > { %1045 = vst [vmem:[%s1971_s21 + $0x60] sm:$0xff] %v1029_v4  ;;  %v1015_v32 = vmax.f32 %v997_v40, 0.0 }
 0x4a2   : > { %1046 = vst [vmem:[%s1971_s21 + $0x68] sm:$0xff] %v1030_v6  ;;  %v1016_v1 = vmax.f32 %v999_v7, 0.0 }
 0x4a3   : > { %v1031_v8 = vadd.f32 %v1015_v32, %v1676_v52 }
 0x4a4   : > { %v1032_v43 = vadd.f32 %v1016_v1, %v1660_v44 }
 0x4a5   : > { %1047 = vst [vmem:[%s1971_s21 + $0x70] sm:$0xff] %v1031_v8 }
 0x4a6   : > { %1048 = vst [vmem:[%s1971_s21 + $0x78] sm:$0xff] %v1032_v43 }
 0x4a7   : > { %1399 = shalt.err (!%p1396_p3)
}
 0x4a8   : > { %s1400_s25 = scalar_lea.hbm %s2005_s10, 2048  ;;  %s1404_s21 = scalar_lea.hbm %s2063_s8, 4096 }
 0x4a9   : > { %p1401_p4 = scmp.ne.s32.totalorder %s2005_s10, %s1400_s25  ;;  %p1405_p9 = scmp.lt.u32.totalorder %s2005_s10, %s2063_s8 }
 0x4aa   : > { %p1406_p10 = scmp.lt.u32.totalorder %s1404_s21, %s1400_s25  ;;  %p1408_p12 = scmp.lt.u32.totalorder %s1400_s25, %s2005_s10 }
 0x4ab   : > { %p1402_p7 = pnand %p1401_p4, %p1538_p5 }
 0x4ac   : > { %p1407_p11 = por %p1406_p10, %p1405_p9 }
 0x4ad   : > { %p1403_p8 = pneg %p1402_p7 }
 0x4ae   : > { %p1409_p13 = por %p1408_p12, %p1407_p11 }
 0x4b0   : > { %p1410_p0 = pnand %p1409_p13, %p1403_p8 }
 0x4b2   : > { %1413 = shalt.err (!%p1410_p0)
}
 0x4b3   : > { %s1453_s26 = smov 256   ;;  %s1454_s12 = smov 16  }
 0x4b4   : > { %1341 = dma.vmem_to_hbm [thread:$0]  (%p1538_p5), %s2007_s23, 2048, %s2005_s10, %s2014_s9, %s1453_s26, %s1453_s26, %s1454_s12  }
 0x4b5 PF: > { %p1347_p1 = scmp.ge.s32.totalorder %s1448_s30, 2  ;;  %s1078_s13 = sand.u32 1, %s1436_s27  }
 0x4b6   : > { %s1079_s17 = scalar_lea.sflag [#allocation3], %s1078_s13 }
 0x4b7   : > { %p1344_p2 = pnand %p1347_p1, %p1542_p6 }
 0x4b9   : > { %1431 = dma.done.wait (!%p1344_p2), %s1079_s17, 2048  }
 0x4ba   : > { %1433 = vsyncadd (!%p1344_p2), %s1079_s17, 4294965248  ;;  %p18_p3 = scmp.ge.s32.totalorder %s1525_s11, 4   ;;  %s2066_s27 = smov %s1440_s28 }
 0x4bb   : > { %s2067_s28 = smov %s1444_s29  ;;  %s2068_s29 = smov %s1536_s14 }
 0x4bc   : > { %s2069_s30 = smov %s1525_s11  ;;  %20 = sbr.rel (!%p18_p3) target bundleno = 3 (0x3), region = 87 }
 0x4c3   :  { %1084 = vsyncpa [#allocation3], 1 }
 0x4c4   :  { %1086 = vsyncpa [#allocation3 + $0x1], 1 }

// kernel: tpu_custom_call.1
= control target key start
LH: loop header
LB: loop body
LE: loop exit
PB: predicated region body
PF: predicated region fallthrough
CT: control target
= control target key end

     0   :  { %13 = vsyncpa [#allocation3], 0  ;;  %s2055_s0 = inlined_call_operand.vmem [shape: f32[2,64,256], index: 0, kind: input, shape index: {}]   ;;  %s2056_s1 = inlined_call_operand.vmem [shape: f32[16,64], index: 1, kind: input, shape index: {}]   ;;  %s2057_s2 = inlined_call_operand.vmem [shape: f32[256,64], index: 2, kind: input, shape index: {}]   ;;  %s2058_s3 = inlined_call_operand.vmem [shape: f32[64,256], index: 3, kind: input, shape index: {}]   ;;  %s2059_s4 = inlined_call_operand.vmem [shape: f32[256,16], index: 4, kind: input, shape index: {}]   ;;  %s2060_s5 = inlined_call_operand.vmem [shape: f32[16,256], index: 5, kind: input, shape index: {}]   ;;  %s2061_s6 = inlined_call_operand.vmem [shape: f32[64,48], index: 6, kind: input, shape index: {}]   ;;  %s2062_s7 = inlined_call_operand.vmem [shape: f32[64,1], index: 7, kind: input, shape index: {}]   ;;  %s2063_s8 = inlined_call_operand.hbm [shape: f32[2,64,256], index: 8, kind: output, shape index: {}]  }
   0x1   :  { %15 = vsyncpa [#allocation3 + $0x1], 0  ;;  %s1500_s27 = smov 0   ;;  %s1502_s28 = smov 0  }
   0x2   :  { %s1504_s29 = smov 0   ;;  %s1506_s30 = smov 0  }
   0x3 LB: > { %s1521_s9 = sadd.s32 4294967295, %s1448_s30   ;;  %s1125_s10 = sadd.s32 4294967294, %s1448_s30   ;;  %s1448_s30 = sphi %s1506_s30, %s2069_s30   ;;  %s1444_s29 = sphi %s1504_s29, %s2068_s29   ;;  %s1440_s28 = sphi %s1502_s28, %s2067_s28   ;;  %s1436_s27 = sphi %s1500_s27, %s2066_s27  }
   0x4   : > { %s1525_s11 = sadd.s32 1, %s1448_s30   ;;  %s201_s12 = sadd.s32 1, %s1444_s29 }
   0x5   : > { %s198_s13 = ssub.s32 %s1448_s30, %s1525_s11  ;;  %p211_p0 = scmp.ne.s32.totalorder %s1444_s29, %s1440_s28 }
   0x6   : > { %p199_p1 = scmp.eq.s32.totalorder %s198_s13, 0  ;;  %p212_p2 = scmp.eq.s32.totalorder %s1521_s9, 1 }
   0x7   : > { %p217_p3 = scmp.ne.s32.totalorder %s1440_s28, %s1436_s27  ;;  %p218_p4 = scmp.eq.s32.totalorder %s1125_s10, 1 }
   0x8   : > { %s1536_s14 = scalar_select %p199_p1, %s1444_s29, %s201_s12  }
   0x9   : > { %p1538_p5 = por %p212_p2, %p211_p0  ;;  %p1542_p6 = por %p218_p4, %p217_p3 }
   0xa   : > { %p1128_p7 = scmp.ge.s32.totalorder %s1448_s30, 1  ;;  %p265_p8 = scmp.lt.s32.totalorder %s1448_s30, 3 }
   0xc   : > { %p266_p9 = pnand %p1128_p7, %p265_p8 }
   0xd   : > { %p299_p10 = scmp.lt.s32.totalorder (!%p266_p9), %s1521_s9, 1  ;;  %v422_v0 = vld [vmem:[%s2057_s2 + $0x80] sm:$0xff] (!%p266_p9)  ;;  %v1450_v1 = vmov (!%p266_p9), 0.0   ;;  %v423_v2 = vld [vmem:[%s2057_s2 + $0x88] sm:$0xff] (!%p266_p9)  ;;  %v424_v7 = vld [vmem:[%s2057_s2 + $0x90] sm:$0xff] (!%p266_p9)  ;;  %vm322_vm0 = vcmask (!%p266_p9), 523264  }
   0xe   : > { %269 = sbr.rel (%p266_p9) target bundleno = 1205 (0x4b5), region = 52  ;;  %393 = vmatprep.mubr.f32.mxu0 (!%p266_p9), %v1450_v1  ;;  %v406_v3 = vld [vmem:[%s2057_s2] sm:$0xff] (!%p266_p9)  ;;  %v407_v4 = vld [vmem:[%s2057_s2 + $0x8] sm:$0xff] (!%p266_p9)  ;;  %v1245_v5 = vpack.c.bf16 (!%p266_p9), %v423_v2, %v422_v0  ;;  %v425_v8 = vld [vmem:[%s2057_s2 + $0x98] sm:$0xff] (!%p266_p9)  ;;  %vm723_vm1 = vcmask (!%p266_p9), 130048   ;;  %vm863_vm2 = vcmask (!%p266_p9), 392192  }
   0xf   : > { %v1247_v6 = vpack.c.bf16 (!%p266_p9), %v407_v4, %v406_v3  ;;  %v408_v9 = vld [vmem:[%s2057_s2 + $0x10] sm:$0xff] (!%p266_p9)  ;;  %v1249_v10 = vpack.c.bf16 (!%p266_p9), %v425_v8, %v424_v7  ;;  %v409_v11 = vld [vmem:[%s2057_s2 + $0x18] sm:$0xff] (!%p266_p9)  ;;  %v426_v12 = vld [vmem:[%s2057_s2 + $0xa0] sm:$0xff] (!%p266_p9)  ;;  %s296_s19 = sand.u32 (!%p266_p9), 1, %s1440_s28   ;;  %s1152_s22 = sshll.u32 (!%p266_p9), %s1521_s9, 11 }
  0x10   : > { %v427_v13 = vld [vmem:[%s2057_s2 + $0xa8] sm:$0xff] (!%p266_p9)  ;;  %1246 = vmatprep.subr.bf16.mxu1 (!%p266_p9), %v1245_v5  ;;  %v410_v14 = vld [vmem:[%s2057_s2 + $0x20] sm:$0xff] (!%p266_p9)  ;;  %v1251_v15 = vpack.c.bf16 (!%p266_p9), %v409_v11, %v408_v9  ;;  %v428_v17 = vld [vmem:[%s2057_s2 + $0xb0] sm:$0xff] (!%p266_p9)  ;;  %s1129_s20 = sshll.u32 (!%p266_p9), %s296_s19, 7  ;;  %s2005_s10 = scalar_lea.hbm (!%p266_p9), %s2063_s8, %s1152_s22 }
  0x11   : > { %1248 = vmatpush3.bf16.msra.mxu1 (!%p266_p9), %v1247_v6  ;;  %v411_v16 = vld [vmem:[%s2057_s2 + $0x28] sm:$0xff] (!%p266_p9)  ;;  %v429_v18 = vld [vmem:[%s2057_s2 + $0xb8] sm:$0xff] (!%p266_p9)  ;;  %v1253_v22 = vpack.c.bf16 (!%p266_p9), %v427_v13, %v426_v12  ;;  %v412_v37 = vld [vmem:[%s2057_s2 + $0x30] sm:$0xff] (!%p266_p9)  ;;  %s1971_s21 = scalar_lea.vmem (!%p266_p9), [#allocation2], %s1129_s20  ;;  %s1452_s13 = smov (!%p266_p9), [#allocation2]  }
  0x12   : > { %1250 = vmatprep.subr.bf16.mxu1 (!%p266_p9), %v1249_v10  ;;  %v1255_v33 = vpack.c.bf16 (!%p266_p9), %v411_v16, %v410_v14  ;;  %v1257_v36 = vpack.c.bf16 (!%p266_p9), %v429_v18, %v428_v17  ;;  %v413_v38 = vld [vmem:[%s2057_s2 + $0x38] sm:$0xff] (!%p266_p9)  ;;  %v430_v41 = vld [vmem:[%s2057_s2 + $0xc0] sm:$0xff] (!%p266_p9)  ;;  %v431_v42 = vld [vmem:[%s2057_s2 + $0xc8] sm:$0xff] (!%p266_p9)  ;;  %s1063_s23 = sshll.u32 (!%p266_p9), %s1971_s21, 4  ;;  %s1390_s17 = sshll.u32 (!%p266_p9), %s1452_s13, 4  ;;  %s2007_s23 = int_to_ptr.vmem [resolvable:$true] %s1063_s23  ;;  %s1391_s17 = int_to_ptr.vmem [resolvable:$false] %s1390_s17 }
  0x13   : > { %v1259_v45 = vpack.c.bf16 (!%p266_p9), %v413_v38, %v412_v37  ;;  %v1261_v48 = vpack.c.bf16 (!%p266_p9), %v431_v42, %v430_v41  ;;  %v414_v49 = vld [vmem:[%s2057_s2 + $0x40] sm:$0xff] (!%p266_p9)  ;;  %v415_v50 = vld [vmem:[%s2057_s2 + $0x48] sm:$0xff] (!%p266_p9)  ;;  %v432_v53 = vld [vmem:[%s2057_s2 + $0xd0] sm:$0xff] (!%p266_p9)  ;;  %s1386_s12 = scalar_lea.vmem (!%p266_p9), %s2007_s23, 2048  ;;  %p1393_p0 = scmp.lt.s32.totalorder (!%p266_p9), %s2007_s23, %s1391_s17 }
  0x14   : > { %v433_v54 = vld [vmem:[%s2057_s2 + $0xd8] sm:$0xff] (!%p266_p9)  ;;  %v1263_v55 = vpack.c.bf16 (!%p266_p9), %v415_v50, %v414_v49  ;;  %v416_v58 = vld [vmem:[%s2057_s2 + $0x50] sm:$0xff] (!%p266_p9)  ;;  %v434_v60 = vld [vmem:[%s2057_s2 + $0xe0] sm:$0xff] (!%p266_p9)  ;;  %p1387_p11 = scmp.ne.s32.totalorder (!%p266_p9), %s2007_s23, %s1386_s12 }
  0x15   : > { %s300_s25 = scalar_select %p299_p10, %s1521_s9, 1  ;;  %1252 = vmatpush3.bf16.msra.mxu1 %v1251_v15  ;;  %v1265_v57 = vpack.c.bf16 %v433_v54, %v432_v53  ;;  %v417_v59 = vld [vmem:[%s2057_s2 + $0x58] sm:$0xff]  ;;  %v435_v61 = vld [vmem:[%s2057_s2 + $0xe8] sm:$0xff]  ;;  %v320_v63 = vld [vmem:[%s2056_s1] sm:$0xff] }
  0x16   : > { %1254 = vmatprep.subr.bf16.mxu1 %v1253_v22  ;;  %v1267_v62 = vpack.c.bf16 %v417_v59, %v416_v58  ;;  %v1269_v0 = vpack.c.bf16 %v435_v61, %v434_v60  ;;  %v418_v2 = vld [vmem:[%s2057_s2 + $0x60] sm:$0xff]  ;;  %v419_v3 = vld [vmem:[%s2057_s2 + $0x68] sm:$0xff]  ;;  %v436_v4 = vld [vmem:[%s2057_s2 + $0xf0] sm:$0xff]  ;;  %s2014_s9 = scalar_lea.sflag [#allocation3], %s296_s19  ;;  %p1388_p12 = pnand %p1387_p11, %p1538_p5 }
  0x17   : > { %s1151_s26 = sshll.u32 %s300_s25, 7  ;;  %v437_v5 = vld [vmem:[%s2057_s2 + $0xf8] sm:$0xff]  ;;  %v1271_v6 = vpack.c.bf16 %v419_v3, %v418_v2  ;;  %v321_v7 = vld [vmem:[%s2056_s1 + $0x8] sm:$0xff]  ;;  %v420_v9 = vld [vmem:[%s2057_s2 + $0x70] sm:$0xff] }
  0x18   : > { %s1587_s18 = scalar_lea.vmem %s2055_s0, %s1151_s26  ;;  %v1273_v8 = vpack.c.bf16 %v437_v5, %v436_v4  ;;  %v421_v10 = vld [vmem:[%s2057_s2 + $0x78] sm:$0xff]  ;;  %v514_v12 = vld [vmem:[%s2058_s3 + $0x8] sm:$0xff]  ;;  %v513_v14 = vld [vmem:[%s2058_s3] sm:$0xff]  ;;  %p1389_p13 = pneg %p1388_p12 }
  0x19   : > { %v1599_v19 = vld [vmem:[%s1587_s18 + $0x8] sm:$0xff]  ;;  %v1602_v20 = vld [vmem:[%s1587_s18 + $0x18] sm:$0xff]  ;;  %v1605_v21 = vld [vmem:[%s1587_s18] sm:$0xff]  ;;  %1256 = vmatpush3.bf16.msra.mxu1 %v1255_v33  ;;  %v1275_v11 = vpack.c.bf16 %v421_v10, %v420_v9 }
  0x1a   : > { %v1229_v23 = vpack.c.bf16 %v1602_v20, %v1599_v19  ;;  %v1610_v24 = vld [vmem:[%s1587_s18 + $0x10] sm:$0xff]  ;;  %v1613_v25 = vld [vmem:[%s1587_s18 + $0x28] sm:$0xff]  ;;  %v1616_v26 = vld [vmem:[%s1587_s18 + $0x38] sm:$0xff]  ;;  %1258 = vmatprep.subr.bf16.mxu1 %v1257_v36 }
  0x1b   : > { %v1231_v27 = vpack.c.bf16 %v1610_v24, %v1605_v21  ;;  %v1233_v28 = vpack.c.bf16 %v1616_v26, %v1613_v25  ;;  %v1623_v29 = vld [vmem:[%s1587_s18 + $0x20] sm:$0xff]  ;;  %v1626_v30 = vld [vmem:[%s1587_s18 + $0x30] sm:$0xff]  ;;  %v1629_v31 = vld [vmem:[%s1587_s18 + $0x48] sm:$0xff] }
  0x1c   : > { %1230 = vmatprep.subr.bf16.mxu0 %v1229_v23  ;;  %v1632_v32 = vld [vmem:[%s1587_s18 + $0x58] sm:$0xff]  ;;  %v1235_v34 = vpack.c.bf16 %v1626_v30, %v1623_v29  ;;  %v1637_v35 = vld [vmem:[%s1587_s18 + $0x40] sm:$0xff]  ;;  %v1648_v40 = vld [vmem:[%s1587_s18 + $0x50] sm:$0xff] }
  0x1d   : > { %1232 = vmatpush1.bf16.msra.mxu0 %v1231_v27  ;;  %v1237_v39 = vpack.c.bf16 %v1632_v32, %v1629_v31  ;;  %v1657_v43 = vld [vmem:[%s1587_s18 + $0x68] sm:$0xff]  ;;  %v1660_v44 = vld [vmem:[%s1587_s18 + $0x78] sm:$0xff]  ;;  %v1239_v46 = vpack.c.bf16 %v1648_v40, %v1637_v35  ;;  %v1665_v47 = vld [vmem:[%s1587_s18 + $0x60] sm:$0xff]  ;;  %1260 = vmatpush3.bf16.msra.mxu1 %v1259_v45 }
  0x1e   : > { %1234 = vmatprep.subr.bf16.mxu0 %v1233_v28  ;;  %v1241_v51 = vpack.c.bf16 %v1660_v44, %v1657_v43  ;;  %v1676_v52 = vld [vmem:[%s1587_s18 + $0x70] sm:$0xff]  ;;  %1262 = vmatprep.subr.bf16.mxu1 %v1261_v48  ;;  %v516_v13 = vld [vmem:[%s2058_s3 + $0x18] sm:$0xff]  ;;  %v518_v17 = vld [vmem:[%s2058_s3 + $0x28] sm:$0xff]  ;;  %s1392_s18 = scalar_lea.vmem %s1391_s17, 4096 }
  0x1f   : > { %v1243_v56 = vpack.c.bf16 %v1676_v52, %v1665_v47  ;;  %v1277_v15 = vpack.c.bf16 %v516_v13, %v514_v12  ;;  %v515_v16 = vld [vmem:[%s2058_s3 + $0x10] sm:$0xff]  ;;  %v520_v18 = vld [vmem:[%s2058_s3 + $0x38] sm:$0xff]  ;;  %v517_v27 = vld [vmem:[%s2058_s3 + $0x20] sm:$0xff]  ;;  %p1394_p1 = scmp.lt.s32.totalorder %s1392_s18, %s1386_s12 }
  0x20   : > { %v1279_v22 = vpack.c.bf16 %v515_v16, %v513_v14  ;;  %v1281_v23 = vpack.c.bf16 %v520_v18, %v518_v17  ;;  %v519_v28 = vld [vmem:[%s2058_s3 + $0x30] sm:$0xff]  ;;  %v522_v33 = vld [vmem:[%s2058_s3 + $0x48] sm:$0xff]  ;;  %v521_v38 = vld [vmem:[%s2058_s3 + $0x40] sm:$0xff] }
  0x21   : > { %1236 = vmatpush1.bf16.msra.mxu0 %v1235_v34  ;;  %1264 = vmatpush3.bf16.msra.mxu1 %v1263_v55  ;;  %v524_v34 = vld [vmem:[%s2058_s3 + $0x58] sm:$0xff]  ;;  %v1283_v36 = vpack.c.bf16 %v519_v28, %v517_v27  ;;  %v526_v41 = vld [vmem:[%s2058_s3 + $0x68] sm:$0xff]  ;;  %v525_v55 = vld [vmem:[%s2058_s3 + $0x60] sm:$0xff]  ;;  %p1395_p2 = por %p1394_p1, %p1393_p0 }
  0x22   : > { %1238 = vmatprep.subr.bf16.mxu0 %v1237_v39  ;;  %1266 = vmatprep.subr.bf16.mxu1 %v1265_v57  ;;  %v1285_v37 = vpack.c.bf16 %v524_v34, %v522_v33  ;;  %v523_v39 = vld [vmem:[%s2058_s3 + $0x50] sm:$0xff]  ;;  %v528_v42 = vld [vmem:[%s2058_s3 + $0x78] sm:$0xff]  ;;  %v628_v58 = vld [vmem:[%s2059_s4 + $0x80] sm:$0xff] }
  0x23   : > { %v1287_v45 = vpack.c.bf16 %v523_v39, %v521_v38  ;;  %v629_v59 = vld [vmem:[%s2059_s4 + $0x88] sm:$0xff]  ;;  %v612_v61 = vld [vmem:[%s2059_s4] sm:$0xff]  ;;  %v634_v18 = vld [vmem:[%s2059_s4 + $0xb0] sm:$0xff]  ;;  %p1396_p3 = pnand %p1395_p2, %p1389_p13 }
  0x24   : > { %v1293_v60 = vpack.c.bf16 %v629_v59, %v628_v58  ;;  %v632_v9 = vld [vmem:[%s2059_s4 + $0xa0] sm:$0xff]  ;;  %v633_v10 = vld [vmem:[%s2059_s4 + $0xa8] sm:$0xff]  ;;  %v618_v28 = vld [vmem:[%s2059_s4 + $0x30] sm:$0xff] }
  0x25   : > { %1240 = vmatpush1.bf16.msra.mxu0 %v1239_v46  ;;  %1268 = vmatpush3.bf16.msra.mxu1 %v1267_v62  ;;  %v1289_v46 = vpack.c.bf16 %v528_v42, %v526_v41  ;;  %v613_v62 = vld [vmem:[%s2059_s4 + $0x8] sm:$0xff]  ;;  %v616_v16 = vld [vmem:[%s2059_s4 + $0x20] sm:$0xff]  ;;  %v619_v33 = vld [vmem:[%s2059_s4 + $0x38] sm:$0xff] }
  0x26   : > { %1242 = vmatprep.subr.bf16.mxu0 %v1241_v51  ;;  %1270 = vmatprep.subr.bf16.mxu1 %v1269_v0  ;;  %v631_v0 = vld [vmem:[%s2059_s4 + $0x98] sm:$0xff]  ;;  %v1295_v4 = vpack.c.bf16 %v613_v62, %v612_v61  ;;  %v617_v17 = vld [vmem:[%s2059_s4 + $0x28] sm:$0xff]  ;;  %v636_v34 = vld [vmem:[%s2059_s4 + $0xc0] sm:$0xff] }
  0x27   : > { %v620_v39 = vld [vmem:[%s2059_s4 + $0x40] sm:$0xff]  ;;  %v621_v41 = vld [vmem:[%s2059_s4 + $0x48] sm:$0xff]  ;;  %v638_v42 = vld [vmem:[%s2059_s4 + $0xd0] sm:$0xff] }
  0x28   : > { %v624_v59 = vld [vmem:[%s2059_s4 + $0x60] sm:$0xff]  ;;  %v642_v61 = vld [vmem:[%s2059_s4 + $0xf0] sm:$0xff]  ;;  %v643_v62 = vld [vmem:[%s2059_s4 + $0xf8] sm:$0xff] }
  0x29   : > { %1244 = vmatpush1.bf16.msra.mxu0 %v1243_v56  ;;  %1272 = vmatpush3.bf16.msra.mxu1 %v1271_v6  ;;  %v527_v56 = vld [vmem:[%s2058_s3 + $0x70] sm:$0xff] }
  0x2a   : > { %1274 = vmatprep.subr.bf16.mxu1 %v1273_v8  ;;  %1278 = vmatprep.subr.bf16.mxu0 %v1277_v15  ;;  %v1291_v57 = vpack.c.bf16 %v527_v56, %v525_v55  ;;  %v615_v8 = vld [vmem:[%s2059_s4 + $0x18] sm:$0xff]  ;;  %v1301_v15 = vpack.c.bf16 %v633_v10, %v632_v9  ;;  %v640_v55 = vld [vmem:[%s2059_s4 + $0xe0] sm:$0xff]  ;;  %v641_v56 = vld [vmem:[%s2059_s4 + $0xe8] sm:$0xff] }
  0x2b   : > { %v1317_v58 = vpack.c.bf16 %v641_v56, %v640_v55  ;;  %v808_v55 = vld [vmem:[%s2061_s6 + $0x8] sm:$0xff]  ;;  %v809_v56 = vld [vmem:[%s2061_s6 + $0x10] sm:$0xff] }
  0x2c   : > { %1132 = vmatmul.mubr.msk.f32.vlgmr.msra.gmra.mrb[0].mxu0 %vm322_vm0, %v320_v63  ;;  %v630_v63 = vld [vmem:[%s2059_s4 + $0x90] sm:$0xff] }
  0x2d   : > { %399 = vmatprep.mubr.f32.mxu0 %v1450_v1  ;;  %1276 = vmatpush3.bf16.msra.mxu1 %v1275_v11  ;;  %v1297_v6 = vpack.c.bf16 %v631_v0, %v630_v63  ;;  %v1321_v0 = vpack.c.bf16 %v643_v62, %v642_v61  ;;  %v814_v61 = vld [vmem:[%s2061_s6 + $0x38] sm:$0xff] }
  0x2e   : > { %1280 = vmatpush1.bf16.msra.mxu0 %v1279_v22  ;;  %v635_v22 = vld [vmem:[%s2059_s4 + $0xb8] sm:$0xff] }
  0x2f   : > { %1282 = vmatprep.subr.bf16.mxu0 %v1281_v23  ;;  %v1303_v23 = vpack.c.bf16 %v617_v17, %v616_v16  ;;  %v1305_v27 = vpack.c.bf16 %v635_v22, %v634_v18 }
  0x30   : > { %1133 = vmatmul.mubr.msk.f32.gmra.mrb[2].mxu0 %vm322_vm0, %v321_v7  ;;  %v614_v7 = vld [vmem:[%s2059_s4 + $0x10] sm:$0xff] }
  0x31   : > { %599 = vmatprep.mubr.f32.mxu0 %v1450_v1  ;;  %v1299_v13 = vpack.c.bf16 %v615_v8, %v614_v7  ;;  %v719_v7 = vld [vmem:[%s2060_s5] sm:$0xff] }
  0x32   : > { %1284 = vmatpush1.bf16.msra.mxu0 %v1283_v36  ;;  %v637_v36 = vld [vmem:[%s2059_s4 + $0xc8] sm:$0xff] }
  0x33   : > { %1286 = vmatprep.subr.bf16.mxu0 %v1285_v37  ;;  %v1307_v37 = vpack.c.bf16 %v619_v33, %v618_v28  ;;  %v1309_v38 = vpack.c.bf16 %v637_v36, %v636_v34  ;;  %v1451_v28 = vmov 0   ;;  %v816_v33 = vld [vmem:[%s2062_s7 + $0x8] sm:$0xff]  ;;  %v818_v34 = vld [vmem:[%s2062_s7 + $0x18] sm:$0xff] }
  0x34   : > { %1384 = vset.pattern.permute.xlu0 %v1451_v28  ;;  %1385 = vset.pattern.permute.xlu1 %v1451_v28  ;;  %v820_v36 = vld [vmem:[%s2062_s7 + $0x28] sm:$0xff] }
  0x36   : > { %1288 = vmatpush1.bf16.msra.mxu0 %v1287_v45  ;;  %v639_v45 = vld [vmem:[%s2059_s4 + $0xd8] sm:$0xff] }
  0x37   : > { %1290 = vmatprep.subr.bf16.mxu0 %v1289_v46  ;;  %v1311_v46 = vpack.c.bf16 %v621_v41, %v620_v39  ;;  %v821_v39 = vld [vmem:[%s2062_s7 + $0x30] sm:$0xff] }
  0x3a   : > { %1292 = vmatpush1.bf16.msra.mxu0 %v1291_v57 }
  0x3b   : > { %1294 = vmatprep.subr.bf16.mxu0 %v1293_v60  ;;  %v625_v60 = vld [vmem:[%s2059_s4 + $0x68] sm:$0xff] }
  0x3c   : > { %v1319_v63 = vpack.c.bf16 %v625_v60, %v624_v59  ;;  %v812_v59 = vld [vmem:[%s2061_s6 + $0x28] sm:$0xff]  ;;  %v813_v60 = vld [vmem:[%s2061_s6 + $0x30] sm:$0xff] }
  0xff   : > { %v1768_v48 = vpop.f32.mrb[0].mxu0 }
 0x100   : > { %v397_v49 = vpop.f32.mrb[1].mxu0 }
 0x101   : > { %502 = vmatprep.mubr.f32.mxu1 %v397_v49 }
 0x102   : > { %503 = vmatmul.mubr.f32.vlgmr.msra.gmra.mrb[0].mxu1 %v1768_v48 }
 0x103   : > { %v1771_v50 = vpop.f32.mrb[2].mxu0 }
 0x104   : > { %v1331_v51 = vpack.c.bf16 %v1771_v50, %v1768_v48  ;;  %v1775_v53 = vpop.f32.mrb[3].mxu0 }
 0x105   : > { %v1329_v54 = vpack.c.bf16 %v1775_v53, %v397_v49  ;;  %507 = vmatprep.mubr.f32.mxu1 %v1775_v53 }
 0x106   : > { %508 = vmatmul.mubr.f32.gmra.mrb[2].mxu1 %v1771_v50 }
 0x107   : > { %1330 = vmatprep.subr.bf16.mxu1 %v1329_v54  ;;  %952 = vmatprep.mubr.f32.mxu1 %v1450_v1  ;;  %v623_v54 = vld [vmem:[%s2059_s4 + $0x58] sm:$0xff] }
 0x108   : > { %1332 = vmatpush1.bf16.msra.mxu1 %v1331_v51  ;;  %v622_v51 = vld [vmem:[%s2059_s4 + $0x50] sm:$0xff] }
 0x109   : > { %v1315_v57 = vpack.c.bf16 %v623_v54, %v622_v51  ;;  %v807_v54 = vld [vmem:[%s2061_s6] sm:$0xff] }
 0x1d5   : > { %v1185_v2 = vpop.f32.mrb[0].mxu1 }
 0x1d6   : > { %v1186_v3 = vpop.f32.mrb[1].mxu1 }
 0x1d7   : > { %v1187_v5 = vadd.f32 %v1186_v3, %v1185_v2  ;;  %v626_v2 = vld [vmem:[%s2059_s4 + $0x70] sm:$0xff]  ;;  %v627_v3 = vld [vmem:[%s2059_s4 + $0x78] sm:$0xff] }
 0x1d9   : > { %v1188_v11 = vpop.f32.mrb[2].mxu1  ;;  %1134 = vmatmul.mubr.msk.f32.vlgmr.msra.gmra.mrb[4].mxu0 %vm322_vm0, %v1187_v5  ;;  %v720_v5 = vld [vmem:[%s2060_s5 + $0x8] sm:$0xff] }
 0x1da   : > { %1296 = vmatpush3.bf16.msra.mxu0 %v1295_v4  ;;  %v1189_v12 = vpop.f32.mrb[3].mxu1  ;;  %605 = vmatprep.mubr.f32.mxu0 %v1450_v1  ;;  %v1323_v4 = vpack.c.bf16 %v627_v3, %v626_v2 }
 0x1db   : > { %v1190_v14 = vadd.f32 %v1189_v12, %v1188_v11  ;;  %1298 = vmatprep.subr.bf16.mxu0 %v1297_v6  ;;  %v722_v6 = vld [vmem:[%s2060_s5 + $0x18] sm:$0xff] }
 0x1dc   : > { %v1325_v8 = vpack.c.bf16 %v722_v6, %v720_v5 }
 0x1dd   : > { %1135 = vmatmul.mubr.msk.f32.gmra.mrb[6].mxu0 %vm322_vm0, %v1190_v14 }
 0x1de   : > { %1300 = vmatpush3.bf16.msra.mxu0 %v1299_v13  ;;  %708 = vmatprep.mubr.f32.mxu0 %v397_v49  ;;  %v1313_v49 = vpack.c.bf16 %v639_v45, %v638_v42 }
 0x1df   : > { %1302 = vmatprep.subr.bf16.mxu0 %v1301_v15 }
 0x1e2   : > { %1304 = vmatpush3.bf16.msra.mxu0 %v1303_v23  ;;  %v815_v23 = vld [vmem:[%s2062_s7] sm:$0xff] }
 0x1e3   : > { %1306 = vmatprep.subr.bf16.mxu0 %v1305_v27  ;;  %v817_v27 = vld [vmem:[%s2062_s7 + $0x10] sm:$0xff]  ;;  %825 = vperm.xlu0 %1384, %v815_v23  }
 0x1e4   : > { %835 = vperm.xlu1 %1385, %v817_v27  }
 0x1e6   : > { %1308 = vmatpush3.bf16.msra.mxu0 %v1307_v37  ;;  %v819_v37 = vld [vmem:[%s2062_s7 + $0x20] sm:$0xff] }
 0x1e7   : > { %1310 = vmatprep.subr.bf16.mxu0 %v1309_v38  ;;  %830 = vperm.xlu0 %1384, %v816_v33   ;;  %v822_v38 = vld [vmem:[%s2062_s7 + $0x38] sm:$0xff] }
 0x1e8   : > { %840 = vperm.xlu1 %1385, %v818_v34  }
 0x1ea   : > { %1312 = vmatpush3.bf16.msra.mxu0 %v1311_v46 }
 0x1eb   : > { %1314 = vmatprep.subr.bf16.mxu0 %v1313_v49  ;;  %845 = vperm.xlu0 %1384, %v819_v37  }
 0x1ec   : > { %850 = vperm.xlu1 %1385, %v820_v36  }
 0x1ee   : > { %1316 = vmatpush3.bf16.msra.mxu0 %v1315_v57  ;;  %v810_v57 = vld [vmem:[%s2061_s6 + $0x18] sm:$0xff] }
 0x1ef   : > { %1318 = vmatprep.subr.bf16.mxu0 %v1317_v58  ;;  %855 = vperm.xlu0 %1384, %v821_v39   ;;  %v811_v58 = vld [vmem:[%s2061_s6 + $0x20] sm:$0xff] }
 0x1f0   : > { %860 = vperm.xlu1 %1385, %v822_v38  }
 0x1f2   : > { %1320 = vmatpush3.bf16.msra.mxu0 %v1319_v63 }
 0x1f3   : > { %1322 = vmatprep.subr.bf16.mxu0 %v1321_v0 }
 0x1f6   : > { %1324 = vmatpush3.bf16.msra.mxu0 %v1323_v4 }
 0x1f7   : > { %1326 = vmatprep.subr.bf16.mxu0 %v1325_v8 }
 0x1f9   : > { %709 = vmatmul.mubr.f32.vlgmr.msra.gmra.mrb[8].mxu0 %v1768_v48  ;;  %v721_v48 = vld [vmem:[%s2060_s5 + $0x10] sm:$0xff] }
 0x1fa   : > { %713 = vmatprep.mubr.f32.mxu0 %v1775_v53 }
 0x1fd   : > { %714 = vmatmul.mubr.f32.gmra.mrb[10].mxu0 %v1771_v50  ;;  %v1327_v50 = vpack.c.bf16 %v721_v48, %v719_v7 }
 0x1fe   : > { %794 = vmatprep.mubr.f32.mxu0 %v1450_v1 }
 0x1ff   : > { %1328 = vmatpush1.bf16.msra.mxu0 %v1327_v50 }
 0x262   : > { %v826_v62 = vpop.permute.xlu0 %825 }
 0x266   : > { %v831_v4 = vpop.permute.xlu0 %830 }
 0x2ac   : > { %v601_v53 = vpop.f32.mrb[4].mxu0 }
 0x2ad   : > { %v603_v9 = vpop.f32.mrb[5].mxu0 }
 0x2b0   : > { %v607_v10 = vpop.f32.mrb[6].mxu0 }
 0x2b1   : > { %v1335_v11 = vpack.c.bf16 %v607_v10, %v601_v53  ;;  %v609_v12 = vpop.f32.mrb[7].mxu0  ;;  %v836_v53 = vpop.permute.xlu1 %835 }
 0x2b2   : > { %v1333_v13 = vpack.c.bf16 %v609_v12, %v603_v9 }
 0x2b4   : > { %1334 = vmatprep.subr.bf16.mxu1 %v1333_v13 }
 0x2b5   : > { %1336 = vmatpush1.bf16.msra.mxu1 %v1335_v11 }
 0x2cc   : > { %v1223_v14 = vpop.f32.mrb[8].mxu0 }
 0x2cd   : > { %v1224_v15 = vpop.f32.mrb[9].mxu0 }
 0x2ce   : > { %v1225_v16 = vadd.f32 %v1224_v15, %v1223_v14 }
 0x2d0   : > { %v1226_v17 = vpop.f32.mrb[10].mxu0  ;;  %1136 = vmatmul.mubr.msk.f32.vlgmr.msra.gmra.mrb[12].mxu0 %vm723_vm1, %v1225_v16 }
 0x2d1   : > { %v1227_v18 = vpop.f32.mrb[11].mxu0  ;;  %800 = vmatprep.mubr.f32.mxu0 %v1450_v1 }
 0x2d2   : > { %v1228_v22 = vadd.f32 %v1227_v18, %v1226_v17  ;;  %v841_v17 = vpop.permute.xlu1 %840 }
 0x2d4   : > { %1137 = vmatmul.mubr.msk.f32.gmra.mrb[14].mxu0 %vm723_vm1, %v1228_v22 }
 0x3a3   : > { %v796_v41 = vpop.f32.mrb[12].mxu0 }
 0x3a4   : > { %v798_v42 = vpop.f32.mrb[13].mxu0 }
 0x3a7   : > { %v802_v45 = vpop.f32.mrb[14].mxu0 }
 0x3a8   : > { %v1339_v46 = vpack.c.bf16 %v802_v45, %v796_v41  ;;  %v804_v49 = vpop.f32.mrb[15].mxu0 }
 0x3a9   : > { %v1337_v51 = vpack.c.bf16 %v804_v49, %v798_v42 }
 0x3ab   : > { %1338 = vmatprep.subr.bf16.mxu1 %v1337_v51 }
 0x3ac   : > { %1340 = vmatpush1.bf16.msra.mxu1 %v1339_v46 }
 0x3af   : > { %1138 = vmatmul.mubr.msk.f32.vlgmr.msra.gmra.mrb[4].mxu1 %vm863_vm2, %v807_v54 }
 0x3b0   : > { %958 = vmatprep.mubr.f32.mxu1 %v1450_v1 }
 0x3b3   : > { %1139 = vmatmul.mubr.msk.f32.gmra.mrb[6].mxu1 %vm863_vm2, %v808_v55 }
 0x3b4   : > { %964 = vmatprep.mubr.f32.mxu1 %v1450_v1 }
 0x3b7   : > { %1140 = vmatmul.mubr.msk.f32.gmra.mrb[8].mxu1 %vm863_vm2, %v809_v56 }
 0x3b8   : > { %970 = vmatprep.mubr.f32.mxu1 %v1450_v1 }
 0x3bb   : > { %1141 = vmatmul.mubr.msk.f32.gmra.mrb[10].mxu1 %vm863_vm2, %v810_v57 }
 0x3bc   : > { %976 = vmatprep.mubr.f32.mxu1 %v1450_v1 }
 0x3bf   : > { %1142 = vmatmul.mubr.msk.f32.gmra.mrb[12].mxu1 %vm863_vm2, %v811_v58 }
 0x3c0   : > { %982 = vmatprep.mubr.f32.mxu1 %v1450_v1 }
 0x3c3   : > { %1143 = vmatmul.mubr.msk.f32.gmra.mrb[14].mxu1 %vm863_vm2, %v812_v59 }
 0x3c4   : > { %988 = vmatprep.mubr.f32.mxu1 %v1450_v1 }
 0x3c7   : > { %1144 = vmatmul.mubr.msk.f32.gmra.mrb[16].mxu1 %vm863_vm2, %v813_v60 }
 0x3c8   : > { %994 = vmatprep.mubr.f32.mxu1 %v1450_v1 }
 0x3cb   : > { %1145 = vmatmul.mubr.msk.f32.gmra.mrb[18].mxu1 %vm863_vm2, %v814_v61 }
 0x482   : > { %v954_v63 = vpop.f32.mrb[4].mxu1 }
 0x483   : > { %v955_v0 = vadd.f32 %v954_v63, %v826_v62  ;;  %v956_v2 = vpop.f32.mrb[5].mxu1 }
 0x484   : > { %v957_v3 = vadd.f32 %v956_v2, %v826_v62 }
 0x485   : > { %v1001_v5 = vmax.f32 %v955_v0, 0.0 }
 0x486   : > { %v1002_v6 = vmax.f32 %v957_v3, 0.0  ;;  %v960_v7 = vpop.f32.mrb[6].mxu1 }
 0x487   : > { %v1017_v1 = vadd.f32 %v1001_v5, %v1605_v21  ;;  %v961_v8 = vadd.f32 %v960_v7, %v831_v4  ;;  %v962_v48 = vpop.f32.mrb[7].mxu1 }
 0x488   : > { %v1018_v50 = vadd.f32 %v1002_v6, %v1599_v19  ;;  %v963_v9 = vadd.f32 %v962_v48, %v831_v4 }
 0x489   : > { %1033 = vst [vmem:[%s1971_s21] sm:$0xff] %v1017_v1  ;;  %v1003_v10 = vmax.f32 %v961_v8, 0.0 }
 0x48a   : > { %1034 = vst [vmem:[%s1971_s21 + $0x8] sm:$0xff] %v1018_v50  ;;  %v1004_v11 = vmax.f32 %v963_v9, 0.0  ;;  %v966_v12 = vpop.f32.mrb[8].mxu1 }
 0x48b   : > { %v1019_v13 = vadd.f32 %v1003_v10, %v1610_v24  ;;  %v967_v21 = vadd.f32 %v966_v12, %v836_v53  ;;  %v968_v14 = vpop.f32.mrb[9].mxu1 }
 0x48c   : > { %v1020_v19 = vadd.f32 %v1004_v11, %v1602_v20  ;;  %v969_v15 = vadd.f32 %v968_v14, %v836_v53  ;;  %v846_v20 = vpop.permute.xlu0 %845 }
 0x48d   : > { %1035 = vst [vmem:[%s1971_s21 + $0x10] sm:$0xff] %v1019_v13  ;;  %v1005_v16 = vmax.f32 %v967_v21, 0.0 }
 0x48e   : > { %1036 = vst [vmem:[%s1971_s21 + $0x18] sm:$0xff] %v1020_v19  ;;  %v1006_v18 = vmax.f32 %v969_v15, 0.0  ;;  %v972_v22 = vpop.f32.mrb[10].mxu1 }
 0x48f   : > { %v1021_v23 = vadd.f32 %v1005_v16, %v1623_v29  ;;  %v973_v27 = vadd.f32 %v972_v22, %v841_v17  ;;  %v974_v28 = vpop.f32.mrb[11].mxu1 }
 0x490   : > { %v1022_v24 = vadd.f32 %v1006_v18, %v1613_v25  ;;  %v975_v33 = vadd.f32 %v974_v28, %v841_v17  ;;  %v851_v25 = vpop.permute.xlu1 %850 }
 0x491   : > { %1037 = vst [vmem:[%s1971_s21 + $0x20] sm:$0xff] %v1021_v23  ;;  %v1007_v34 = vmax.f32 %v973_v27, 0.0 }
 0x492   : > { %1038 = vst [vmem:[%s1971_s21 + $0x28] sm:$0xff] %v1022_v24  ;;  %v1008_v36 = vmax.f32 %v975_v33, 0.0  ;;  %v978_v37 = vpop.f32.mrb[12].mxu1 }
 0x493   : > { %v1023_v38 = vadd.f32 %v1007_v34, %v1626_v30  ;;  %v979_v39 = vadd.f32 %v978_v37, %v846_v20  ;;  %v980_v41 = vpop.f32.mrb[13].mxu1 }
 0x494   : > { %v1024_v29 = vadd.f32 %v1008_v36, %v1616_v26  ;;  %v981_v42 = vadd.f32 %v980_v41, %v846_v20  ;;  %v856_v26 = vpop.permute.xlu0 %855  ;;  %v861_v0 = vpop.permute.xlu1 %860 }
 0x495   : > { %1039 = vst [vmem:[%s1971_s21 + $0x30] sm:$0xff] %v1023_v38  ;;  %v1009_v45 = vmax.f32 %v979_v39, 0.0 }
 0x496   : > { %1040 = vst [vmem:[%s1971_s21 + $0x38] sm:$0xff] %v1024_v29  ;;  %v1010_v46 = vmax.f32 %v981_v42, 0.0  ;;  %v984_v49 = vpop.f32.mrb[14].mxu1 }
 0x497   : > { %v1025_v51 = vadd.f32 %v1009_v45, %v1637_v35  ;;  %v985_v54 = vadd.f32 %v984_v49, %v851_v25  ;;  %v986_v55 = vpop.f32.mrb[15].mxu1 }
 0x498   : > { %v1026_v30 = vadd.f32 %v1010_v46, %v1629_v31  ;;  %v987_v56 = vadd.f32 %v986_v55, %v851_v25 }
 0x499   : > { %1041 = vst [vmem:[%s1971_s21 + $0x40] sm:$0xff] %v1025_v51  ;;  %v1011_v57 = vmax.f32 %v985_v54, 0.0 }
 0x49a   : > { %1042 = vst [vmem:[%s1971_s21 + $0x48] sm:$0xff] %v1026_v30  ;;  %v1012_v58 = vmax.f32 %v987_v56, 0.0  ;;  %v990_v59 = vpop.f32.mrb[16].mxu1 }
 0x49b   : > { %v1027_v60 = vadd.f32 %v1011_v57, %v1648_v40  ;;  %v991_v61 = vadd.f32 %v990_v59, %v856_v26  ;;  %v992_v62 = vpop.f32.mrb[17].mxu1 }
 0x49c   : > { %v1028_v35 = vadd.f32 %v1012_v58, %v1632_v32  ;;  %v993_v63 = vadd.f32 %v992_v62, %v856_v26 }
 0x49d   : > { %1043 = vst [vmem:[%s1971_s21 + $0x50] sm:$0xff] %v1027_v60  ;;  %v1013_v31 = vmax.f32 %v991_v61, 0.0 }
 0x49e   : > { %1044 = vst [vmem:[%s1971_s21 + $0x58] sm:$0xff] %v1028_v35  ;;  %v1014_v2 = vmax.f32 %v993_v63, 0.0  ;;  %v996_v3 = vpop.f32.mrb[18].mxu1 }
 0x49f   : > { %v1029_v4 = vadd.f32 %v1013_v31, %v1665_v47  ;;  %v997_v40 = vadd.f32 %v996_v3, %v861_v0  ;;  %v998_v5 = vpop.f32.mrb[19].mxu1 }
 0x4a0   : > { %v1030_v6 = vadd.f32 %v1014_v2, %v1657_v43  ;;  %v999_v7 = vadd.f32 %v998_v5, %v861_v0 }
 0x4a1   : > { %1045 = vst [vmem:[%s1971_s21 + $0x60] sm:$0xff] %v1029_v4  ;;  %v1015_v32 = vmax.f32 %v997_v40, 0.0 }
 0x4a2   : > { %1046 = vst [vmem:[%s1971_s21 + $0x68] sm:$0xff] %v1030_v6  ;;  %v1016_v1 = vmax.f32 %v999_v7, 0.0 }
 0x4a3   : > { %v1031_v8 = vadd.f32 %v1015_v32, %v1676_v52 }
 0x4a4   : > { %v1032_v43 = vadd.f32 %v1016_v1, %v1660_v44 }
 0x4a5   : > { %1047 = vst [vmem:[%s1971_s21 + $0x70] sm:$0xff] %v1031_v8 }
 0x4a6   : > { %1048 = vst [vmem:[%s1971_s21 + $0x78] sm:$0xff] %v1032_v43 }
 0x4a7   : > { %1399 = shalt.err (!%p1396_p3)
}
 0x4a8   : > { %s1400_s25 = scalar_lea.hbm %s2005_s10, 2048  ;;  %s1404_s21 = scalar_lea.hbm %s2063_s8, 4096 }
 0x4a9   : > { %p1401_p4 = scmp.ne.s32.totalorder %s2005_s10, %s1400_s25  ;;  %p1405_p9 = scmp.lt.u32.totalorder %s2005_s10, %s2063_s8 }
 0x4aa   : > { %p1406_p10 = scmp.lt.u32.totalorder %s1404_s21, %s1400_s25  ;;  %p1408_p12 = scmp.lt.u32.totalorder %s1400_s25, %s2005_s10 }
 0x4ab   : > { %p1402_p7 = pnand %p1401_p4, %p1538_p5 }
 0x4ac   : > { %p1407_p11 = por %p1406_p10, %p1405_p9 }
 0x4ad   : > { %p1403_p8 = pneg %p1402_p7 }
 0x4ae   : > { %p1409_p13 = por %p1408_p12, %p1407_p11 }
 0x4b0   : > { %p1410_p0 = pnand %p1409_p13, %p1403_p8 }
 0x4b2   : > { %1413 = shalt.err (!%p1410_p0)
}
 0x4b3   : > { %s1453_s26 = smov 256   ;;  %s1454_s12 = smov 16  }
 0x4b4   : > { %1341 = dma.vmem_to_hbm [thread:$0]  (%p1538_p5), %s2007_s23, 2048, %s2005_s10, %s2014_s9, %s1453_s26, %s1453_s26, %s1454_s12  }
 0x4b5 PF: > { %p1347_p1 = scmp.ge.s32.totalorder %s1448_s30, 2  ;;  %s1078_s13 = sand.u32 1, %s1436_s27  }
 0x4b6   : > { %s1079_s17 = scalar_lea.sflag [#allocation3], %s1078_s13 }
 0x4b7   : > { %p1344_p2 = pnand %p1347_p1, %p1542_p6 }
 0x4b9   : > { %1431 = dma.done.wait (!%p1344_p2), %s1079_s17, 2048  }
 0x4ba   : > { %1433 = vsyncadd (!%p1344_p2), %s1079_s17, 4294965248  ;;  %p18_p3 = scmp.ge.s32.totalorder %s1525_s11, 4   ;;  %s2066_s27 = smov %s1440_s28 }
 0x4bb   : > { %s2067_s28 = smov %s1444_s29  ;;  %s2068_s29 = smov %s1536_s14 }
 0x4bc   : > { %s2069_s30 = smov %s1525_s11  ;;  %20 = sbr.rel (!%p18_p3) target bundleno = 3 (0x3), region = 87 }
 0x4c3   :  { %1084 = vsyncpa [#allocation3], 1 }
 0x4c4   :  { %1086 = vsyncpa [#allocation3 + $0x1], 1 }

</bundles_post_ra>
